<compile_context>
chip_gen: v5e
topology: v5e:2x2
jax: 0.10.0
libtpu: 0.0.40
codegen_flags: <defaults>
</compile_context>

<pallas_src>
import functools
import math

import jax
import jax.numpy as jnp
from jax import lax
from jax.experimental import pallas as pl
from jax.experimental.pallas import tpu as pltpu


def _aace_kernel(target_ref, pred_ref, out_ref, *, th, mode):
    """One (block_n, C) tile: per-row adaptive adversarial CE, lane-dense out."""
    pred = pred_ref[...].astype(jnp.float32)               # (bn, C)
    tgt = target_ref[...]                                    # (bn, 1) int32
    bn, c = pred.shape

    # one-hot(target) mask via an iota compare (no gather needed)
    col = lax.broadcasted_iota(jnp.int32, (bn, c), 1)
    is_t = col == tgt                                        # (bn, C)

    m = jnp.max(pred, axis=-1, keepdims=True)                # (bn, 1)
    x = pred - m                                             # shifted logits <= 0
    e = jnp.exp(x)                                           # (bn, C) EUP
    xt_masked = jnp.where(is_t, x, 0.0)                      # single nonzero / row

    # Class-axis sums on the (idle) MXU so per-row results come out lane-dense:
    # ones(8,C) @ y(bn,C)^T -> (8, bn), all rows identical; keep row 0.
    # HIGHEST keeps the f32 operands exact through the MXU; the MXU is far from
    # the binding slot here (EUP exp / VPU / DMA are), so the extra passes are
    # hidden, and lower precision enums are not guaranteed to lower in Mosaic.
    ones8 = jnp.ones((8, c), jnp.float32)

    def rowsum_lanes(y):
        return lax.dot_general(
            ones8, y,
            dimension_numbers=(((1,), (1,)), ((), ())),      # A @ B^T
            preferred_element_type=jnp.float32,
            precision=lax.Precision.HIGHEST)[0:1, :]         # (1, bn)

    s = rowsum_lanes(e)                                      # softmax denominator
    xt = rowsum_lanes(xt_masked)                             # shifted logit at target
    log_s = jnp.log(s)
    pe = jnp.exp(xt)                                         # exp at true class
    se = s - pe                                              # sum of non-true exps
    pp = pe / s                                              # true-class prob
    frac = se / s                                            # 1 - pp (stable)

    if mode == "ada":
        # ad = prob*(1-onehot): sum(ad) = 1-pp and log(np_adv_j) - log_prob_j
        # == -log(1-pp), so the off-diagonal KL collapses to -log(1-pp).
        # frac == 0 (pp -> 1) matches the reference's target_prob>0 masking.
        off = jnp.where(frac > 0.0, -jnp.log(frac), 0.0)
    else:  # "const"
        # ad = 1-onehot: off-diag KL = -log(C-1) - mean_{j!=t}(x_j) + log(s)
        sx = rowsum_lanes(x) - xt                            # sum of non-true x
        cm1 = float(c - 1)
        off = (log_s - sx * (1.0 / cm1)) - math.log(cm1)

    # true-class (diagonal) KL term: pp_adv * (log(pp_adv) - log_softmax_t)
    log_prob_t = xt - log_s                                  # exact log_softmax[t]
    pp_adv = pp - jnp.maximum(pp - th, 0.0)                  # == min(pp, th)
    pos = pp_adv > 0.0
    safe = jnp.where(pos, pp_adv, 1.0)
    diag = jnp.where(pos, pp_adv * (jnp.log(safe) - log_prob_t), 0.0)

    out_ref[0] = (off + diag).astype(out_ref.dtype)          # (1, bn) lane-dense


def _num_tensorcores():
    """Best-effort TensorCore-per-device count (megacore chips -> 2)."""
    try:
        info = pltpu.get_tpu_info()
        for name in ("num_cores", "num_tensorcores", "tensorcore_count",
                     "tensor_cores_per_chip", "cores_per_chip"):
            v = getattr(info, name, None)
            if isinstance(v, int) and 0 < v <= 8:
                return v
    except Exception:
        pass
    try:
        kind = jax.devices()[0].device_kind.lower()
        if any(t in kind for t in ("v4", "v5p", "v7", "7x")):
            return 2
    except Exception:
        pass
    return 1


def _resolve_block_n(n, c, itemsize, requested, num_cores):
    """Rows per grid step.  Always returns a block that divides N (or equals
    N), so no boundary blocks and (almost) never a wrapper-side pad.
    Returns (block_n, needs_pad)."""
    if n <= 8:
        return n, False

    if requested is None:
        target = (2 << 20) // max(1, c * itemsize)           # ~2 MiB logits/tile
        target = max(8, min(2048, target))
        if num_cores > 1:                                    # >= 2 steps / core
            target = min(target, max(8, -(-n // (2 * num_cores))))
    else:
        target = max(8, int(requested))
    target = min(target, n)
    target = (target // 128) * 128 if target >= 128 else (target // 8) * 8
    target = max(8, target)

    if n % target == 0:
        return target, False

    # Aligned divisor of N close to the target (prefer multiples of 128).
    lo = max(8, target // 4)
    for step in (128, 8):
        start = (target // step) * step
        for cand in range(start, lo - 1, -step):
            if cand >= 8 and n % cand == 0:
                return cand, False

    # Single block covering every row (legal: block dim == full array dim),
    # if the working set stays comfortably inside scoped VMEM.
    if n * c * 4 * 7 <= (40 << 20):
        return n, False

    # Last resort for huge awkward N: pad (extra HBM pass over the logits).
    return target, True


def _vmem_limit_bytes(block_n, c, itemsize):
    tile_native = block_n * c * itemsize
    tile_f32 = block_n * c * 4
    # 2x double-buffered native-dtype input tile + ~6x f32 tile of in-kernel
    # temporaries (upcast, iota/mask, exp, MXU staging) + fixed slack.
    budget = 2 * tile_native + 6 * tile_f32 + (4 << 20)
    upper = 100 << 20
    try:
        cap = getattr(pltpu.get_tpu_info(), "vmem_capacity_bytes", None)
        if isinstance(cap, int) and cap > (16 << 20):
            upper = cap - (8 << 20)
    except Exception:
        pass
    return int(max(min(budget, upper), min(32 << 20, upper)))


def adaptive_adversarial_cross_entropy(pred, target, *, th=0.0, mode="ada",
                                       block_n=None):
    """Forward of AdaptiveAdversrialCrossEntropy: pred (N, C) logits,
    target (N,) int labels -> (N,) f32 per-sample loss."""
    n, c = pred.shape
    mode = mode.lower()
    if mode not in ("ada", "const"):
        # TODO(synk): mode='rand' needs torch.rand-equivalent draws
        # (pltpu.prng_seed + pltpu.prng_random_bits); not implemented.
        raise NotImplementedError(f"mode={mode!r} not supported")

    itemsize = jnp.dtype(pred.dtype).itemsize
    block_n, needs_pad = _resolve_block_n(n, c, itemsize, block_n,
                                          _num_tensorcores())

    tgt = target.astype(jnp.int32).reshape(n, 1)
    n_rows = n
    if needs_pad:                                            # rare last resort
        n_rows = pl.cdiv(n, block_n) * block_n
        pred = jnp.pad(pred, ((0, n_rows - n), (0, 0)))
        tgt = jnp.pad(tgt, ((0, n_rows - n), (0, 0)))
    grid = n_rows // block_n

    kernel = functools.partial(_aace_kernel, th=float(th), mode=mode)
    out = pl.pallas_call(
        kernel,
        out_shape=jax.ShapeDtypeStruct((grid, 1, block_n), jnp.float32),
        grid_spec=pltpu.PrefetchScalarGridSpec(
            num_scalar_prefetch=0,
            grid=(grid,),
            in_specs=[
                pl.BlockSpec((block_n, 1), lambda i: (i, 0)),   # labels (column)
                pl.BlockSpec((block_n, c), lambda i: (i, 0)),   # logits, native dtype
            ],
            out_specs=pl.BlockSpec((1, 1, block_n), lambda i: (i, 0, 0)),
        ),
        compiler_params=pltpu.CompilerParams(
            dimension_semantics=("parallel",),
            vmem_limit_bytes=_vmem_limit_bytes(block_n, c, itemsize)),
    )(tgt, pred)
    return out.reshape(grid * block_n)[:n]


def _reference(pred, target, *, th=0.0, mode="ada"):
    """Plain-JAX mirror of the PyTorch forward, for verification."""
    c = pred.shape[1]
    onehot = jax.nn.one_hot(target, c, dtype=jnp.float32)
    prob = jax.nn.softmax(pred.astype(jnp.float32), axis=1)
    pp = jnp.sum(prob * onehot, axis=1, keepdims=True)
    np_ = prob * (1.0 - onehot)
    dp = jax.nn.relu(pp - th)
    pp_adv = pp - dp
    ad = np_ if mode == "ada" else (1.0 - onehot)
    np_adv = ad / jnp.sum(ad, axis=1, keepdims=True)
    target_prob = pp_adv * onehot + np_adv
    log_prob = jax.nn.log_softmax(pred.astype(jnp.float32), axis=1)
    pos = target_prob > 0.0
    safe_t = jnp.where(pos, target_prob, 1.0)
    kl = jnp.where(pos, target_prob * (jnp.log(safe_t) - log_prob), 0.0)
    return kl.sum(-1)


if __name__ == "__main__":
    # Module has no learnable parameters; only (N, C) logits + (N,) labels.
    N, C = 256, 128
    key = jax.random.PRNGKey(0)
    k_pred, k_tgt = jax.random.split(key)
    pred = jax.random.normal(k_pred, (N, C), dtype=jnp.float32)
    target = jax.random.randint(k_tgt, (N,), 0, C, dtype=jnp.int32)

    # 1) module defaults (mode='ada', th=0), auto tile choice
    out = jax.block_until_ready(
        adaptive_adversarial_cross_entropy(pred, target))
    ref = _reference(pred, target, th=0.0, mode="ada")
    assert out.shape == (N,)
    assert jnp.allclose(out, ref, atol=5e-5, rtol=5e-5)

    # 2) th > 0 exercises the true-class KL term; explicit 128-row tiles -> grid 2
    out2 = jax.block_until_ready(
        adaptive_adversarial_cross_entropy(pred, target, th=0.25, block_n=128))
    ref2 = _reference(pred, target, th=0.25, mode="ada")
    assert jnp.allclose(out2, ref2, atol=5e-5, rtol=5e-5)

    # 3) bf16 logits stay bf16 through the DMA (kernel upcasts internally)
    pred_bf16 = pred.astype(jnp.bfloat16)
    out3 = jax.block_until_ready(
        adaptive_adversarial_cross_entropy(pred_bf16, target))
    ref3 = _reference(pred_bf16.astype(jnp.float32), target, th=0.0, mode="ada")
    assert jnp.allclose(out3, ref3, atol=5e-5, rtol=5e-5)

    # 4) mode='const' branch
    out4 = jax.block_until_ready(
        adaptive_adversarial_cross_entropy(pred, target, th=0.1, mode="const"))
    ref4 = _reference(pred, target, th=0.1, mode="const")
    assert jnp.allclose(out4, ref4, atol=5e-5, rtol=5e-5)

    # 5) N not a multiple of the preferred tile: block_n resolves to an aligned
    #    divisor of N (no wrapper-side jnp.pad of the logits, no boundary blocks)
    Nu = 200
    out5 = jax.block_until_ready(
        adaptive_adversarial_cross_entropy(pred[:Nu], target[:Nu]))
    ref5 = _reference(pred[:Nu], target[:Nu], th=0.0, mode="ada")
    assert out5.shape == (Nu,)
    assert jnp.allclose(out5, ref5, atol=5e-5, rtol=5e-5)

    print("KERNEL_OK")
</pallas_src>

<mosaic_0001>
module attributes {stable_mosaic.version = 11 : i64} {
  func.func @_aace_kernel(%arg0: i32, %arg1: memref<256x1xi32, #tpu.memory_space<vmem>>, %arg2: memref<256x128xf32, #tpu.memory_space<vmem>>, %arg3: memref<1x1x256xf32, #tpu.memory_space<vmem>>) attributes {dimension_semantics = [#tpu.dimension_semantics<parallel>], iteration_bounds = array<i64: 1>, scalar_prefetch = 0 : i64, scratch_operands = 0 : i64, tpu.core_type = #tpu.core_type<tc>, window_params = [{transform_indices = @transform_0, window_bounds = array<i64: 256, 1>}, {transform_indices = @transform_1, window_bounds = array<i64: 256, 128>}, {transform_indices = @transform_2, window_bounds = array<i64: 1, 1, 256>}]} {
    %c0 = arith.constant 0 : index
    %c0_0 = arith.constant 0 : index
    %0 = vector.load %arg2[%c0, %c0_0] : memref<256x128xf32, #tpu.memory_space<vmem>>, vector<256x128xf32>
    %c0_1 = arith.constant 0 : index
    %c0_2 = arith.constant 0 : index
    %1 = vector.load %arg1[%c0_1, %c0_2] : memref<256x1xi32, #tpu.memory_space<vmem>>, vector<256x1xi32>
    %2 = tpu.iota {dimensions = array<i32: 1>} : vector<256x128xi32>
    %3 = vector.broadcast %1 : vector<256x1xi32> to vector<256x128xi32>
    %4 = arith.cmpi eq, %2, %3 : vector<256x128xi32>
    %cst = arith.constant dense<0xFF800000> : vector<256xf32>
    %5 = vector.multi_reduction <maximumf>, %0, %cst [1] : vector<256x128xf32> to vector<256xf32>
    %6 = vector.shape_cast %5 : vector<256xf32> to vector<256x1xf32>
    %7 = vector.broadcast %6 : vector<256x1xf32> to vector<256x128xf32>
    %8 = arith.subf %0, %7 : vector<256x128xf32>
    %9 = math.exp %8 : vector<256x128xf32>
    %cst_3 = arith.constant 0.000000e+00 : f32
    %10 = vector.broadcast %cst_3 : f32 to vector<256x128xf32>
    %11 = arith.select %4, %8, %10 : vector<256x128xi1>, vector<256x128xf32>
    %cst_4 = arith.constant 1.000000e+00 : f32
    %12 = vector.broadcast %cst_4 : f32 to vector<8x128xf32>
    %cst_5 = arith.constant dense<0.000000e+00> : vector<8x256xf32>
    %13 = tpu.matmul %12, %9, %cst_5 {dimension_numbers = #tpu.dot_dimension_numbers<[1], [1], [0], [0], [0, 0, 1, 0], [], []>, precision = #tpu.contract_precision<fp32>} : vector<8x128xf32>, vector<256x128xf32>, vector<8x256xf32> -> vector<8x256xf32>
    %14 = vector.extract_strided_slice %13 {offsets = [0, 0], sizes = [1, 256], strides = [1, 1]} : vector<8x256xf32> to vector<1x256xf32>
    %cst_6 = arith.constant dense<0.000000e+00> : vector<8x256xf32>
    %15 = tpu.matmul %12, %11, %cst_6 {dimension_numbers = #tpu.dot_dimension_numbers<[1], [1], [0], [0], [0, 0, 1, 0], [], []>, precision = #tpu.contract_precision<fp32>} : vector<8x128xf32>, vector<256x128xf32>, vector<8x256xf32> -> vector<8x256xf32>
    %16 = vector.extract_strided_slice %15 {offsets = [0, 0], sizes = [1, 256], strides = [1, 1]} : vector<8x256xf32> to vector<1x256xf32>
    %17 = math.log %14 : vector<1x256xf32>
    %18 = math.exp %16 : vector<1x256xf32>
    %19 = arith.subf %14, %18 : vector<1x256xf32>
    %20 = arith.divf %18, %14 : vector<1x256xf32>
    %21 = arith.divf %19, %14 : vector<1x256xf32>
    %cst_7 = arith.constant 0.000000e+00 : f32
    %22 = vector.broadcast %cst_7 : f32 to vector<1x256xf32>
    %23 = arith.cmpf ogt, %21, %22 : vector<1x256xf32>
    %24 = math.log %21 : vector<1x256xf32>
    %cst_8 = arith.constant 0.000000e+00 : f32
    %25 = vector.broadcast %cst_8 : f32 to vector<1x256xf32>
    %26 = arith.subf %25, %24 : vector<1x256xf32>
    %cst_9 = arith.constant 0.000000e+00 : f32
    %27 = vector.broadcast %cst_9 : f32 to vector<1x256xf32>
    %28 = arith.select %23, %26, %27 : vector<1x256xi1>, vector<1x256xf32>
    %29 = arith.subf %16, %17 : vector<1x256xf32>
    %cst_10 = arith.constant 0.000000e+00 : f32
    %30 = vector.broadcast %cst_10 : f32 to vector<1x256xf32>
    %31 = arith.subf %20, %30 : vector<1x256xf32>
    %cst_11 = arith.constant 0.000000e+00 : f32
    %32 = vector.broadcast %cst_11 : f32 to vector<1x256xf32>
    %33 = arith.maximumf %31, %32 : vector<1x256xf32>
    %34 = arith.subf %20, %33 : vector<1x256xf32>
    %cst_12 = arith.constant 0.000000e+00 : f32
    %35 = vector.broadcast %cst_12 : f32 to vector<1x256xf32>
    %36 = arith.cmpf ogt, %34, %35 : vector<1x256xf32>
    %cst_13 = arith.constant 1.000000e+00 : f32
    %37 = vector.broadcast %cst_13 : f32 to vector<1x256xf32>
    %38 = arith.select %36, %34, %37 : vector<1x256xi1>, vector<1x256xf32>
    %39 = math.log %38 : vector<1x256xf32>
    %40 = arith.subf %39, %29 : vector<1x256xf32>
    %41 = arith.mulf %34, %40 : vector<1x256xf32>
    %cst_14 = arith.constant 0.000000e+00 : f32
    %42 = vector.broadcast %cst_14 : f32 to vector<1x256xf32>
    %43 = arith.select %36, %41, %42 : vector<1x256xi1>, vector<1x256xf32>
    %44 = arith.addf %28, %43 : vector<1x256xf32>
    %c0_15 = arith.constant 0 : index
    %c0_16 = arith.constant 0 : index
    %c0_17 = arith.constant 0 : index
    %45 = vector.load %arg3[%c0_15, %c0_16, %c0_17] : memref<1x1x256xf32, #tpu.memory_space<vmem>>, vector<1x1x256xf32>
    %46 = vector.shape_cast %45 : vector<1x1x256xf32> to vector<1x256xf32>
    %47 = vector.shape_cast %44 : vector<1x256xf32> to vector<1x1x256xf32>
    tpu.vector_store %arg3[%c0_15, %c0_16, %c0_17], %47 {strides = array<i32>} : memref<1x1x256xf32, #tpu.memory_space<vmem>>, vector<1x1x256xf32>,
    return
  }
  func.func @transform_0(%arg0: i32) -> (i32, i32) {
    %c0_i32 = arith.constant 0 : i32
    %c0_i32_0 = arith.constant 0 : i32
    return %arg0, %c0_i32 : i32, i32
  }
  func.func @transform_1(%arg0: i32) -> (i32, i32) {
    %c0_i32 = arith.constant 0 : i32
    %c0_i32_0 = arith.constant 0 : i32
    return %arg0, %c0_i32 : i32, i32
  }
  func.func @transform_2(%arg0: i32) -> (i32, i32, i32) {
    %c0_i32 = arith.constant 0 : i32
    %c0_i32_0 = arith.constant 0 : i32
    %c0_i32_1 = arith.constant 0 : i32
    return %arg0, %c0_i32, %c0_i32_0 : i32, i32, i32
  }
}

</mosaic_0001>

<bundles_post_ra>
// kernel: tpu_custom_call.1
= control target key start
LH: loop header
LB: loop body
LE: loop exit
PB: predicated region body
PF: predicated region fallthrough
CT: control target
= control target key end

     0   :  { %s3474_s0 = inlined_call_operand.vmem [shape: s32[256,1], index: 0, kind: input, shape index: {}]   ;;  %s3475_s1 = inlined_call_operand.vmem [shape: f32[256,128], index: 1, kind: input, shape index: {}]   ;;  %s3476_s2 = inlined_call_operand.hbm [shape: f32[1,1,256], index: 2, kind: output, shape index: {}]  }
   0x1   :  { %v1950_v0 = vld [vmem:[%s3475_s1 + $0xf8] sm:$0xff]  ;;  %v1955_v1 = vld [vmem:[%s3475_s1 + $0xf0] sm:$0xff] }
   0x2   :  { %v1960_v2 = vld [vmem:[%s3475_s1 + $0x78] sm:$0xff]  ;;  %268 = vmax.xlane.f32.xlu1 %v1950_v0  ;;  %266 = vmax.xlane.f32.xlu2 %v1955_v1 }
   0x3   :  { %236 = vmax.xlane.f32.xlu0 %v1960_v2 }
   0x4   :  { %7 = vsyncpa [#allocation3], 0  ;;  %v1968_v3 = vld [vmem:[%s3475_s1 + $0x68] sm:$0xff]  ;;  %v1973_v4 = vld [vmem:[%s3475_s1 + $0x60] sm:$0xff]  ;;  %v1928_v21 = vmov 0   ;;  %s1802_s25 = sshll.u32 %s3476_s2, 4  ;;  %s1803_s25 = int_to_ptr.hbm [resolvable:$true] %s1802_s25 }
   0x5   :  { %v1978_v5 = vld [vmem:[%s3475_s1 + $0x70] sm:$0xff]  ;;  %v1986_v6 = vld [vmem:[%s3475_s1 + $0xe0] sm:$0xff]  ;;  %v1991_v7 = vld [vmem:[%s3475_s1 + $0x58] sm:$0xff]  ;;  %1816 = vset.pattern.permute.xlu0 %v1928_v21  ;;  %1817 = vset.pattern.permute.xlu1 %v1928_v21 }
   0x6   :  { %v1996_v8 = vld [vmem:[%s3475_s1 + $0xe8] sm:$0xff]  ;;  %v2004_v9 = vld [vmem:[%s3475_s1 + $0xd8] sm:$0xff]  ;;  %v2014_v11 = vld [vmem:[%s3475_s1 + $0x50] sm:$0xff]  ;;  %1815 = vset.pattern.permute.xlu2 %v1928_v21 }
   0x7   :  { %v2009_v10 = vld [vmem:[%s3475_s1 + $0x48] sm:$0xff]  ;;  %v2027_v13 = vld [vmem:[%s3475_s1 + $0x40] sm:$0xff]  ;;  %v2032_v14 = vld [vmem:[%s3475_s1 + $0xd0] sm:$0xff] }
   0x8   :  { %v2022_v12 = vld [vmem:[%s3475_s1 + $0xc8] sm:$0xff]  ;;  %v2040_v15 = vld [vmem:[%s3475_s1 + $0xc0] sm:$0xff]  ;;  %v2045_v16 = vld [vmem:[%s3475_s1 + $0x30] sm:$0xff] }
   0x9   :  { %v2050_v17 = vld [vmem:[%s3475_s1 + $0x38] sm:$0xff]  ;;  %v2058_v18 = vld [vmem:[%s3475_s1 + $0xb0] sm:$0xff]  ;;  %v2063_v19 = vld [vmem:[%s3475_s1 + $0x28] sm:$0xff] }
   0xa   :  { %232 = vmax.xlane.f32.xlu1 %v1968_v3  ;;  %230 = vmax.xlane.f32.xlu2 %v1973_v4  ;;  %v2068_v20 = vld [vmem:[%s3475_s1 + $0xb8] sm:$0xff]  ;;  %v2076_v22 = vld [vmem:[%s3475_s1 + $0xa8] sm:$0xff]  ;;  %v2086_v24 = vld [vmem:[%s3475_s1 + $0x20] sm:$0xff] }
   0xb   :  { %234 = vmax.xlane.f32.xlu0 %v1978_v5  ;;  %v2081_v23 = vld [vmem:[%s3475_s1 + $0x18] sm:$0xff]  ;;  %v2099_v26 = vld [vmem:[%s3475_s1 + $0x10] sm:$0xff]  ;;  %v2104_v27 = vld [vmem:[%s3475_s1 + $0xa0] sm:$0xff] }
   0xc   :  { %v2094_v25 = vld [vmem:[%s3475_s1 + $0x98] sm:$0xff]  ;;  %v2112_v28 = vld [vmem:[%s3475_s1 + $0x90] sm:$0xff]  ;;  %v2117_v29 = vld [vmem:[%s3475_s1] sm:$0xff] }
   0xd   :  { %v2122_v30 = vld [vmem:[%s3475_s1 + $0x8] sm:$0xff]  ;;  %v2130_v31 = vld [vmem:[%s3475_s1 + $0x80] sm:$0xff]  ;;  %v59_v33 = vld [vmem:[%s3474_s0 + $0x78] sm:$0xff] }
   0xe   :  { %v2135_v32 = vld [vmem:[%s3475_s1 + $0x88] sm:$0xff]  ;;  %v58_v34 = vld [vmem:[%s3474_s0 + $0x70] sm:$0xff]  ;;  %v56_v35 = vld [vmem:[%s3474_s0 + $0x60] sm:$0xff] }
   0xf   :  { %v57_v36 = vld [vmem:[%s3474_s0 + $0x68] sm:$0xff]  ;;  %v51_v37 = vld [vmem:[%s3474_s0 + $0x38] sm:$0xff]  ;;  %v54_v39 = vld [vmem:[%s3474_s0 + $0x50] sm:$0xff] }
  0x10   :  { %v55_v38 = vld [vmem:[%s3474_s0 + $0x58] sm:$0xff]  ;;  %v48_v40 = vld [vmem:[%s3474_s0 + $0x20] sm:$0xff]  ;;  %v53_v45 = vld [vmem:[%s3474_s0 + $0x48] sm:$0xff] }
  0x11   :  { %v52_v46 = vld [vmem:[%s3474_s0 + $0x40] sm:$0xff]  ;;  %v75_v48 = vld [vmem:[%s3474_s0 + $0xf8] sm:$0xff]  ;;  %v50_v55 = vld [vmem:[%s3474_s0 + $0x30] sm:$0xff] }
  0x12   :  { %262 = vmax.xlane.f32.xlu2 %v1986_v6  ;;  %228 = vmax.xlane.f32.xlu1 %v1991_v7  ;;  %v49_v58 = vld [vmem:[%s3474_s0 + $0x28] sm:$0xff]  ;;  %v44_v62 = vld [vmem:[%s3474_s0] sm:$0xff] }
  0x13   :  { %264 = vmax.xlane.f32.xlu0 %v1996_v8 }
  0x1a   :  { %260 = vmax.xlane.f32.xlu1 %v2004_v9  ;;  %224 = vmax.xlane.f32.xlu2 %v2009_v10 }
  0x1b   :  { %226 = vmax.xlane.f32.xlu0 %v2014_v11 }
  0x22   :  { %256 = vmax.xlane.f32.xlu2 %v2022_v12  ;;  %222 = vmax.xlane.f32.xlu1 %v2027_v13 }
  0x23   :  { %258 = vmax.xlane.f32.xlu0 %v2032_v14 }
  0x2a   :  { %254 = vmax.xlane.f32.xlu1 %v2040_v15  ;;  %218 = vmax.xlane.f32.xlu2 %v2045_v16 }
  0x2b   :  { %220 = vmax.xlane.f32.xlu0 %v2050_v17 }
  0x32   :  { %250 = vmax.xlane.f32.xlu2 %v2058_v18  ;;  %216 = vmax.xlane.f32.xlu1 %v2063_v19 }
  0x33   :  { %252 = vmax.xlane.f32.xlu0 %v2068_v20 }
  0x3a   :  { %248 = vmax.xlane.f32.xlu1 %v2076_v22  ;;  %212 = vmax.xlane.f32.xlu2 %v2081_v23 }
  0x3b   :  { %214 = vmax.xlane.f32.xlu0 %v2086_v24 }
  0x42   :  { %244 = vmax.xlane.f32.xlu2 %v2094_v25  ;;  %210 = vmax.xlane.f32.xlu1 %v2099_v26 }
  0x43   :  { %246 = vmax.xlane.f32.xlu0 %v2104_v27 }
  0x4a   :  { %242 = vmax.xlane.f32.xlu1 %v2112_v28  ;;  %206 = vmax.xlane.f32.xlu2 %v2117_v29 }
  0x4b   :  { %208 = vmax.xlane.f32.xlu0 %v2122_v30 }
  0x52   :  { %238 = vmax.xlane.f32.xlu1 %v2130_v31 }
  0x53   :  { %240 = vmax.xlane.f32.xlu0 %v2135_v32 }
  0x62   :  { %124 = vperm.xlu2 %1815, %v59_v33   ;;  %v47_v33 = vld [vmem:[%s3474_s0 + $0x18] sm:$0xff] }
  0x67   :  { %121 = vperm.xlu0 %1816, %v58_v34  }
  0x6a   :  { %115 = vperm.xlu2 %1815, %v56_v35  }
  0x6b   :  { %118 = vperm.xlu1 %1817, %v57_v36   ;;  %v46_v36 = vld [vmem:[%s3474_s0 + $0x10] sm:$0xff] }
  0x6f   :  { %100 = vperm.xlu0 %1816, %v51_v37  }
  0x72   :  { %112 = vperm.xlu2 %1815, %v55_v38  }
  0x73   :  { %109 = vperm.xlu1 %1817, %v54_v39  }
  0x75   :  { %v2163_v41 = vpop.xlane.xlu1 %268  ;;  %v2165_v42 = vpop.xlane.xlu2 %266 }
  0x76   :  { %v237_v43 = vpop.xlane.xlu0 %236 }
  0x77   :  { %v2168_v44 = vsub.f32 %v1960_v2, %v237_v43  ;;  %91 = vperm.xlu0 %1816, %v48_v40  }
  0x79   :  { %3552 = vst [vmem:[#allocation5_spill] sm:$0xff] %v2168_v44  ;;  %v332_v47 = vmul.f32 1.442695, %v2168_v44 }
  0x7a   :  { %106 = vperm.xlu2 %1815, %v53_v45  }
  0x7b   :  { %103 = vperm.xlu1 %1817, %v52_v46   ;;  %1818 = vpow2.f32 %v332_v47 }
  0x7d   :  { %v233_v49 = vpop.xlane.xlu1 %232  ;;  %v231_v50 = vpop.xlane.xlu2 %230 }
  0x7e   :  { %v235_v51 = vpop.xlane.xlu0 %234  ;;  %v2181_v52 = vsub.f32 %v1968_v3, %v233_v49  ;;  %v2184_v53 = vsub.f32 %v1973_v4, %v231_v50 }
  0x7f   :  { %v2187_v54 = vsub.f32 %v1978_v5, %v235_v51  ;;  %172 = vperm.xlu0 %1816, %v75_v48   ;;  %v71_v48 = vld [vmem:[%s3474_s0 + $0xd8] sm:$0xff] }
  0x80   :  { %3553 = vst [vmem:[#allocation6_spill] sm:$0xff] %v2181_v52  ;;  %v328_v56 = vmul.f32 1.442695, %v2181_v52  ;;  %v326_v57 = vmul.f32 1.442695, %v2184_v53 }
  0x81   :  { %3554 = vst [vmem:[#allocation7_spill] sm:$0xff] %v2184_v53  ;;  %v330_v59 = vmul.f32 1.442695, %v2187_v54  ;;  %v1819_v60 = vpop.eup %1818 }
  0x82   :  { %3555 = vst [vmem:[#allocation8_spill] sm:$0xff] %v2187_v54  ;;  %1820 = vpow2.f32 %v328_v56  ;;  %97 = vperm.xlu2 %1815, %v50_v55   ;;  %v2198_v61 = vand.u32 4294901760, %v1819_v60 }
  0x83   :  { %1822 = vpow2.f32 %v330_v59  ;;  %94 = vperm.xlu1 %1817, %v49_v58  }
  0x84   :  { %1824 = vpow2.f32 %v326_v57  ;;  %399 = vmatpush.xpose.msra.mxu0 %v2198_v61  ;;  %587 = vmatpush.xpose.msra.mxu3 %v2198_v61  ;;  %v2206_v63 = vsub.f32 %v1819_v60, %v2198_v61  ;;  %v45_v60 = vld [vmem:[%s3474_s0 + $0x8] sm:$0xff] }
  0x85   :  { %v2208_v2 = vpop.xlane.xlu2 %262  ;;  %v229_v3 = vpop.xlane.xlu1 %228 }
  0x86   :  { %v2210_v4 = vpop.xlane.xlu0 %264  ;;  %v2213_v5 = vsub.f32 %v1991_v7, %v229_v3  ;;  %536 = vmatpush.xpose.msra.mxu2 %v2206_v63  ;;  %v3481_v21 = vand.u32 4294901760, %v2206_v63 }
  0x87   :  { %79 = vperm.xlu0 %1816, %v44_v62  }
  0x88   :  { %3556 = vst [vmem:[#allocation9_spill] sm:$0xff] %v2213_v5  ;;  %v1821_v34 = vpop.eup %1820  ;;  %v324_v35 = vmul.f32 1.442695, %v2213_v5  ;;  %v437_v7 = vsub.f32 %v2206_v63, %v3481_v21 }
  0x89   :  { %v1823_v37 = vpop.eup %1822  ;;  %v2227_v38 = vand.u32 4294901760, %v1821_v34 }
  0x8a   :  { %v1825_v39 = vpop.eup %1824  ;;  %v2229_v40 = vand.u32 4294901760, %v1823_v37  ;;  %88 = vperm.xlu2 %1815, %v47_v33   ;;  %v438_v43 = vand.u32 4294901760, %v437_v7  ;;  %1826 = vpow2.f32 %v324_v35  ;;  %v68_v7 = vld [vmem:[%s3474_s0 + $0xc0] sm:$0xff] }
  0x8b   :  { %85 = vperm.xlu1 %1817, %v46_v36   ;;  %v2232_v45 = vsub.f32 %v1821_v34, %v2227_v38  ;;  %v2234_v46 = vand.u32 4294901760, %v1825_v39 }
  0x8c   :  { %401 = vmatpush.xpose.msra.mxu0 %v2229_v40  ;;  %589 = vmatpush.xpose.msra.mxu3 %v2229_v40  ;;  %v2239_v47 = vsub.f32 %v1823_v37, %v2229_v40 }
  0x8d   :  { %439 = vmatpush.xpose.msra.mxu1 %v438_v43  ;;  %v2244_v49 = vpop.xlane.xlu1 %260  ;;  %v225_v50 = vpop.xlane.xlu2 %224  ;;  %v2252_v57 = vsub.f32 %v1825_v39, %v2234_v46  ;;  %v3478_v58 = vand.u32 4294901760, %v2232_v45 }
  0x8e   :  { %539 = vmatpush.xpose.msra.mxu2 %v2239_v47  ;;  %v227_v51 = vpop.xlane.xlu0 %226  ;;  %v2248_v55 = vsub.f32 %v2009_v10, %v225_v50  ;;  %v3480_v56 = vand.u32 4294901760, %v2239_v47 }
  0x8f   :  { %v2256_v59 = vsub.f32 %v2014_v11, %v227_v51  ;;  %160 = vperm.xlu0 %1816, %v71_v48   ;;  %v74_v11 = vld [vmem:[%s3474_s0 + $0xf0] sm:$0xff]  ;;  %v449_v35 = vsub.f32 %v2232_v45, %v3478_v58  ;;  %v3477_v36 = vand.u32 4294901760, %v2252_v57  ;;  %v65_v58 = vld [vmem:[%s3474_s0 + $0xa8] sm:$0xff] }
  0x90   :  { %3557 = vst [vmem:[#allocation10_spill] sm:$0xff] %v2248_v55  ;;  %v320_v62 = vmul.f32 1.442695, %v2248_v55  ;;  %403 = vmatpush.xpose.msra.mxu0 %v2227_v38  ;;  %591 = vmatpush.xpose.msra.mxu3 %v2227_v38  ;;  %v443_v10 = vsub.f32 %v2239_v47, %v3480_v56  ;;  %v1827_v33 = vpop.eup %1826 }
  0x91   :  { %3558 = vst [vmem:[#allocation11_spill] sm:$0xff] %v2256_v59  ;;  %v322_v3 = vmul.f32 1.442695, %v2256_v59  ;;  %v2276_v37 = vand.u32 4294901760, %v1827_v33 }
  0x92   :  { %542 = vmatpush.xpose.msra.mxu2 %v2232_v45  ;;  %v444_v34 = vand.u32 4294901760, %v443_v10  ;;  %82 = vperm.xlu2 %1815, %v45_v60   ;;  %v450_v60 = vand.u32 4294901760, %v449_v35 }
  0x93   :  { %1828 = vpow2.f32 %v322_v3  ;;  %169 = vperm.xlu1 %1817, %v74_v11   ;;  %v2286_v48 = vsub.f32 %v1827_v33, %v2276_v37  ;;  %v73_v11 = vld [vmem:[%s3474_s0 + $0xe8] sm:$0xff] }
  0x94   :  { %1830 = vpow2.f32 %v320_v62  ;;  %405 = vmatpush.xpose.msra.mxu0 %v2234_v46  ;;  %445 = vmatpush.xpose.msra.mxu1 %v444_v34  ;;  %v455_v62 = vsub.f32 %v2252_v57, %v3477_v36 }
  0x95   :  { %593 = vmatpush.xpose.msra.mxu3 %v2234_v46  ;;  %v2283_v39 = vpop.xlane.xlu2 %256  ;;  %v223_v43 = vpop.xlane.xlu1 %222  ;;  %v3479_v10 = vand.u32 4294901760, %v2286_v48 }
  0x96   :  { %545 = vmatpush.xpose.msra.mxu2 %v2252_v57  ;;  %v2289_v50 = vpop.xlane.xlu0 %258  ;;  %v2292_v51 = vsub.f32 %v2027_v13, %v223_v43  ;;  %v72_v13 = vld [vmem:[%s3474_s0 + $0xe0] sm:$0xff] }
  0x97   :  { %151 = vperm.xlu0 %1816, %v68_v7   ;;  %v456_v7 = vand.u32 4294901760, %v455_v62  ;;  %v461_v43 = vsub.f32 %v2286_v48, %v3479_v10 }
  0x98   :  { %3559 = vst [vmem:[#allocation12_spill] sm:$0xff] %v2292_v51  ;;  %v318_v3 = vmul.f32 1.442695, %v2292_v51  ;;  %407 = vmatpush.xpose.msra.mxu0 %v2276_v37  ;;  %451 = vmatpush.xpose.msra.mxu1 %v450_v60 }
  0x99   :  { %v1829_v33 = vpop.eup %1828  ;;  %595 = vmatpush.xpose.msra.mxu3 %v2276_v37 }
  0x9a   :  { %v1831_v34 = vpop.eup %1830  ;;  %548 = vmatpush.xpose.msra.mxu2 %v2286_v48  ;;  %v2308_v35 = vand.u32 4294901760, %v1829_v33  ;;  %166 = vperm.xlu2 %1815, %v73_v11   ;;  %1832 = vpow2.f32 %v318_v3 }
  0x9b   :  { %163 = vperm.xlu1 %1817, %v72_v13   ;;  %v2313_v60 = vand.u32 4294901760, %v1831_v34 }
  0x9c   :  { %409 = vmatpush.xpose.msra.mxu0 %v2308_v35  ;;  %457 = vmatpush.xpose.msra.mxu1 %v456_v7  ;;  %v2317_v36 = vsub.f32 %v1829_v33, %v2308_v35  ;;  %v462_v33 = vand.u32 4294901760, %v461_v43 }
  0x9d   :  { %597 = vmatpush.xpose.msra.mxu3 %v2308_v35  ;;  %v2323_v62 = vpop.xlane.xlu1 %254  ;;  %v219_v10 = vpop.xlane.xlu2 %218  ;;  %v2326_v11 = vsub.f32 %v1831_v34, %v2313_v60  ;;  %v70_v34 = vld [vmem:[%s3474_s0 + $0xd0] sm:$0xff] }
  0x9e   :  { %551 = vmatpush.xpose.msra.mxu2 %v2317_v36  ;;  %v221_v3 = vpop.xlane.xlu0 %220  ;;  %v2330_v13 = vsub.f32 %v2045_v16, %v219_v10  ;;  %v3483_v7 = vand.u32 4294901760, %v2317_v36 }
  0x9f   :  { %v2334_v56 = vsub.f32 %v2050_v17, %v221_v3  ;;  %142 = vperm.xlu0 %1816, %v65_v58   ;;  %v3486_v21 = vand.u32 4294901760, %v2326_v11  ;;  %v69_v17 = vld [vmem:[%s3474_s0 + $0xc8] sm:$0xff] }
  0xa0   :  { %3560 = vst [vmem:[#allocation13_spill] sm:$0xff] %v2330_v13  ;;  %v314_v51 = vmul.f32 1.442695, %v2330_v13  ;;  %411 = vmatpush.xpose.msra.mxu0 %v2313_v60  ;;  %463 = vmatpush.xpose.msra.mxu1 %v462_v33  ;;  %v467_v16 = vsub.f32 %v2317_v36, %v3483_v7  ;;  %v1833_v10 = vpop.eup %1832  ;;  %v62_v7 = vld [vmem:[%s3474_s0 + $0x90] sm:$0xff] }
  0xa1   :  { %3561 = vst [vmem:[#allocation14_spill] sm:$0xff] %v2334_v56  ;;  %v316_v58 = vmul.f32 1.442695, %v2334_v56  ;;  %599 = vmatpush.xpose.msra.mxu3 %v2313_v60  ;;  %v473_v3 = vsub.f32 %v2326_v11, %v3486_v21  ;;  %v2354_v33 = vand.u32 4294901760, %v1833_v10  ;;  %v66_v21 = vld [vmem:[%s3474_s0 + $0xb0] sm:$0xff] }
  0xa2   :  { %554 = vmatpush.xpose.msra.mxu2 %v2326_v11  ;;  %v468_v43 = vand.u32 4294901760, %v467_v16  ;;  %157 = vperm.xlu2 %1815, %v70_v34  }
  0xa3   :  { %1834 = vpow2.f32 %v316_v58  ;;  %154 = vperm.xlu1 %1817, %v69_v17   ;;  %v2363_v16 = vsub.f32 %v1833_v10, %v2354_v33 }
  0xa4   :  { %1836 = vpow2.f32 %v314_v51  ;;  %469 = vmatpush.xpose.msra.mxu1 %v468_v43  ;;  %413 = vmatpush.xpose.msra.mxu0 %v2354_v33  ;;  %v474_v51 = vand.u32 4294901760, %v473_v3  ;;  %v67_v43 = vld [vmem:[%s3474_s0 + $0xb8] sm:$0xff] }
  0xa5   :  { %v2359_v13 = vpop.xlane.xlu2 %250  ;;  %v217_v56 = vpop.xlane.xlu1 %216  ;;  %601 = vmatpush.xpose.msra.mxu3 %v2354_v33  ;;  %v3490_v58 = vand.u32 4294901760, %v2363_v16 }
  0xa6   :  { %v2366_v34 = vpop.xlane.xlu0 %252  ;;  %v2369_v17 = vsub.f32 %v2063_v19, %v217_v56  ;;  %557 = vmatpush.xpose.msra.mxu2 %v2363_v16 }
  0xa7   :  { %133 = vperm.xlu0 %1816, %v62_v7   ;;  %v479_v19 = vsub.f32 %v2363_v16, %v3490_v58 }
  0xa8   :  { %3562 = vst [vmem:[#allocation15_spill] sm:$0xff] %v2369_v17  ;;  %v312_v10 = vmul.f32 1.442695, %v2369_v17  ;;  %475 = vmatpush.xpose.msra.mxu1 %v474_v51  ;;  %v2394_v17 = vsub.f32 %v1950_v0, %v2163_v41  ;;  %v64_v41 = vld [vmem:[%s3474_s0 + $0xa0] sm:$0xff] }
  0xa9   :  { %v1835_v55 = vpop.eup %1834  ;;  %v480_v3 = vand.u32 4294901760, %v479_v19 }
  0xaa   :  { %v1837_v56 = vpop.eup %1836  ;;  %v2383_v7 = vand.u32 4294901760, %v1835_v55  ;;  %148 = vperm.xlu2 %1815, %v67_v43   ;;  %1838 = vpow2.f32 %v312_v10  ;;  %3563 = vst [vmem:[#allocation16_spill] sm:$0xff] %v2394_v17 }
  0xab   :  { %145 = vperm.xlu1 %1817, %v66_v21   ;;  %v2385_v59 = vand.u32 4294901760, %v1837_v56 }
  0xac   :  { %415 = vmatpush.xpose.msra.mxu0 %v2383_v7  ;;  %603 = vmatpush.xpose.msra.mxu3 %v2383_v7  ;;  %v2390_v51 = vsub.f32 %v1835_v55, %v2383_v7 }
  0xad   :  { %481 = vmatpush.xpose.msra.mxu1 %v480_v3  ;;  %v2396_v58 = vpop.xlane.xlu1 %248  ;;  %v213_v43 = vpop.xlane.xlu2 %212  ;;  %v2399_v21 = vsub.f32 %v1837_v56, %v2385_v59  ;;  %v2415_v56 = vsub.f32 %v1955_v1, %v2165_v42 }
  0xae   :  { %560 = vmatpush.xpose.msra.mxu2 %v2390_v51  ;;  %v215_v10 = vpop.xlane.xlu0 %214  ;;  %v2403_v19 = vsub.f32 %v2081_v23, %v213_v43  ;;  %v3493_v55 = vand.u32 4294901760, %v2390_v51  ;;  %v364_v43 = vmul.f32 1.442695, %v2394_v17 }
  0xaf   :  { %v2407_v5 = vsub.f32 %v2086_v24, %v215_v10  ;;  %v3497_v0 = vand.u32 4294901760, %v2399_v21  ;;  %3566 = vst [vmem:[#allocation19_spill] sm:$0xff] %v2415_v56  ;;  %v63_v24 = vld [vmem:[%s3474_s0 + $0x98] sm:$0xff]  ;;  %v362_v53 = vmul.f32 1.442695, %v2415_v56 }
  0xb0   :  { %3564 = vst [vmem:[#allocation17_spill] sm:$0xff] %v2403_v19  ;;  %v308_v3 = vmul.f32 1.442695, %v2403_v19  ;;  %417 = vmatpush.xpose.msra.mxu0 %v2385_v59  ;;  %605 = vmatpush.xpose.msra.mxu3 %v2385_v59  ;;  %v485_v23 = vsub.f32 %v2390_v51, %v3493_v55  ;;  %v1839_v1 = vpop.eup %1838 }
  0xb1   :  { %3565 = vst [vmem:[#allocation18_spill] sm:$0xff] %v2407_v5  ;;  %v310_v10 = vmul.f32 1.442695, %v2407_v5  ;;  %v491_v19 = vsub.f32 %v2399_v21, %v3497_v0  ;;  %v2432_v55 = vand.u32 4294901760, %v1839_v1 }
  0xb2   :  { %563 = vmatpush.xpose.msra.mxu2 %v2399_v21  ;;  %v486_v42 = vand.u32 4294901760, %v485_v23  ;;  %139 = vperm.xlu2 %1815, %v64_v41  }
  0xb3   :  { %1840 = vpow2.f32 %v310_v10  ;;  %136 = vperm.xlu1 %1817, %v63_v24   ;;  %v2439_v23 = vsub.f32 %v1839_v1, %v2432_v55  ;;  %v492_v10 = vand.u32 4294901760, %v491_v19  ;;  %v61_v1 = vld [vmem:[%s3474_s0 + $0x88] sm:$0xff] }
  0xb4   :  { %1842 = vpow2.f32 %v308_v3  ;;  %487 = vmatpush.xpose.msra.mxu1 %v486_v42  ;;  %419 = vmatpush.xpose.msra.mxu0 %v2432_v55  ;;  %v2449_v3 = vsub.f32 %v1996_v8, %v2210_v4  ;;  %v2462_v8 = vsub.f32 %v1986_v6, %v2208_v2 }
  0xb5   :  { %1844 = vpow2.f32 %v364_v43  ;;  %v2435_v17 = vpop.xlane.xlu2 %244  ;;  %v211_v5 = vpop.xlane.xlu1 %210  ;;  %607 = vmatpush.xpose.msra.mxu3 %v2432_v55  ;;  %v3500_v43 = vand.u32 4294901760, %v2439_v23 }
  0xb6   :  { %v2442_v41 = vpop.xlane.xlu0 %246  ;;  %v2445_v24 = vsub.f32 %v2099_v26, %v211_v5  ;;  %3568 = vst [vmem:[#allocation21_spill] sm:$0xff] %v2449_v3  ;;  %566 = vmatpush.xpose.msra.mxu2 %v2439_v23  ;;  %1846 = vpow2.f32 %v362_v53  ;;  %v60_v26 = vld [vmem:[%s3474_s0 + $0x80] sm:$0xff]  ;;  %v358_v2 = vmul.f32 1.442695, %v2462_v8  ;;  %s1931_s0 = smov [#allocation2]  }
  0xb7   :  { %3569 = vst [vmem:[#allocation22_spill] sm:$0xff] %v2462_v8  ;;  %v497_v4 = vsub.f32 %v2439_v23, %v3500_v43  ;;  %s1800_s1 = sshll.u32 %s1931_s0, 4  ;;  %s1801_s1 = int_to_ptr.vmem [resolvable:$true] %s1800_s1 }
  0xb8   :  { %3567 = vst [vmem:[#allocation20_spill] sm:$0xff] %v2445_v24  ;;  %v306_v42 = vmul.f32 1.442695, %v2445_v24  ;;  %493 = vmatpush.xpose.msra.mxu1 %v492_v10  ;;  %v360_v10 = vmul.f32 1.442695, %v2449_v3 }
  0xb9   :  { %v1841_v5 = vpop.eup %1840  ;;  %v498_v56 = vand.u32 4294901760, %v497_v4 }
  0xba   :  { %v1843_v19 = vpop.eup %1842  ;;  %v2467_v0 = vand.u32 4294901760, %v1841_v5  ;;  %130 = vperm.xlu2 %1815, %v61_v1   ;;  %1848 = vpow2.f32 %v306_v42 }
  0xbb   :  { %v1845_v53 = vpop.eup %1844  ;;  %127 = vperm.xlu1 %1817, %v60_v26   ;;  %v2470_v24 = vand.u32 4294901760, %v1843_v19  ;;  %1850 = vpow2.f32 %v360_v10 }
  0xbc   :  { %421 = vmatpush.xpose.msra.mxu0 %v2467_v0  ;;  %609 = vmatpush.xpose.msra.mxu3 %v2467_v0  ;;  %v2475_v6 = vsub.f32 %v1841_v5, %v2467_v0  ;;  %v1847_v3 = vpop.eup %1846  ;;  %v2481_v4 = vand.u32 4294901760, %v1845_v53  ;;  %v2490_v5 = vsub.f32 %v2004_v9, %v2244_v49  ;;  %1852 = vpow2.f32 %v358_v2 }
  0xbd   :  { %499 = vmatpush.xpose.msra.mxu1 %v498_v56  ;;  %v207_v43 = vpop.xlane.xlu2 %206  ;;  %v2479_v1 = vsub.f32 %v1843_v19, %v2470_v24 }
  0xbe   :  { %569 = vmatpush.xpose.msra.mxu2 %v2475_v6  ;;  %v209_v42 = vpop.xlane.xlu0 %208  ;;  %v2485_v26 = vsub.f32 %v2117_v29, %v207_v43  ;;  %v3505_v52 = vand.u32 4294901760, %v2475_v6  ;;  %3571 = vst [vmem:[#allocation24_spill] sm:$0xff] %v2490_v5  ;;  %v2502_v43 = vand.u32 4294901760, %v1847_v3 }
  0xbf   :  { %v2493_v56 = vsub.f32 %v2122_v30, %v209_v42  ;;  %v3506_v19 = vand.u32 4294901760, %v2479_v1  ;;  %v2510_v42 = vsub.f32 %v1845_v53, %v2481_v4 }
  0xc0   :  { %3570 = vst [vmem:[#allocation23_spill] sm:$0xff] %v2485_v26  ;;  %v302_v8 = vmul.f32 1.442695, %v2485_v26  ;;  %423 = vmatpush.xpose.msra.mxu0 %v2470_v24  ;;  %611 = vmatpush.xpose.msra.mxu3 %v2470_v24  ;;  %v503_v29 = vsub.f32 %v2475_v6, %v3505_v52  ;;  %v1849_v49 = vpop.eup %1848  ;;  %v356_v26 = vmul.f32 1.442695, %v2490_v5  ;;  %v2515_v52 = vsub.f32 %v2032_v14, %v2289_v50 }
  0xc1   :  { %3572 = vst [vmem:[#allocation25_spill] sm:$0xff] %v2493_v56  ;;  %v304_v9 = vmul.f32 1.442695, %v2493_v56  ;;  %v509_v10 = vsub.f32 %v2479_v1, %v3506_v19  ;;  %v2517_v2 = vand.u32 4294901760, %v1849_v49  ;;  %v2525_v53 = vsub.f32 %v1847_v3, %v2502_v43 }
  0xc2   :  { %1854 = vpow2.f32 %v302_v8  ;;  %572 = vmatpush.xpose.msra.mxu2 %v2479_v1  ;;  %v504_v30 = vand.u32 4294901760, %v503_v29  ;;  %3573 = vst [vmem:[#allocation26_spill] sm:$0xff] %v2515_v52  ;;  %v1851_v8 = vpop.eup %1850  ;;  %v2529_v19 = vsub.f32 %v2022_v12, %v2283_v39  ;;  %v3577_v54 = vand.u32 4294901760, %v2510_v42 }
  0xc3   :  { %1856 = vpow2.f32 %v304_v9  ;;  %3574 = vst [vmem:[#allocation27_spill] sm:$0xff] %v2517_v2  ;;  %v2521_v29 = vsub.f32 %v1849_v49, %v2517_v2  ;;  %v510_v14 = vand.u32 4294901760, %v509_v10  ;;  %v1853_v9 = vpop.eup %1852  ;;  %v2535_v56 = vand.u32 4294901760, %v1851_v8 }
  0xc4   :  { %505 = vmatpush.xpose.msra.mxu1 %v504_v30  ;;  %425 = vmatpush.xpose.msra.mxu0 %v2517_v2  ;;  %3575 = vst [vmem:[#allocation28_spill] sm:$0xff] %v2529_v19  ;;  %1858 = vpow2.f32 %v356_v26  ;;  %v354_v30 = vmul.f32 1.442695, %v2515_v52  ;;  %v2543_v26 = vand.u32 4294901760, %v1853_v9  ;;  %v352_v50 = vmul.f32 1.442695, %v2529_v19 }
  0xc5   :  { %613 = vmatpush.xpose.msra.mxu3 %v2517_v2  ;;  %v3512_v49 = vand.u32 4294901760, %v2521_v29  ;;  %v765_v44 = vsub.f32 %v2510_v42, %v3577_v54  ;;  %v2564_v19 = vsub.f32 %v1851_v8, %v2535_v56 }
  0xc6   :  { %575 = vmatpush.xpose.msra.mxu2 %v2521_v29  ;;  %1860 = vpow2.f32 %v354_v30 }
  0xc7   :  { %v515_v12 = vsub.f32 %v2521_v29, %v3512_v49  ;;  %1862 = vpow2.f32 %v352_v50  ;;  %v3581_v50 = vand.u32 4294901760, %v2206_v63 }
  0xc8   :  { %v1855_v5 = vpop.eup %1854  ;;  %511 = vmatpush.xpose.msra.mxu1 %v510_v14  ;;  %v2553_v14 = vsub.f32 %v2040_v15, %v2323_v62  ;;  %v2568_v15 = vsub.f32 %v2068_v20, %v2366_v34 }
  0xc9   :  { %v1857_v3 = vpop.eup %1856  ;;  %v2540_v39 = vand.u32 4294901760, %v1855_v5  ;;  %v516_v49 = vand.u32 4294901760, %v515_v12  ;;  %v766_v12 = vand.u32 4294901760, %v765_v44 }
  0xca   :  { %v2546_v52 = vand.u32 4294901760, %v1857_v3  ;;  %3578 = vst [vmem:[#allocation30_spill] sm:$0xff] %v2553_v14  ;;  %v1859_v54 = vpop.eup %1858  ;;  %v350_v8 = vmul.f32 1.442695, %v2553_v14  ;;  %v348_v44 = vmul.f32 1.442695, %v2568_v15 }
  0xcb   :  { %v2556_v2 = vsub.f32 %v1855_v5, %v2540_v39  ;;  %3579 = vst [vmem:[#allocation31_spill] sm:$0xff] %v2568_v15  ;;  %v3580_v5 = vand.u32 4294901760, %v2525_v53  ;;  %v3584_v15 = vand.u32 4294901760, %v2239_v47 }
  0xcc   :  { %3576 = vst [vmem:[#allocation29_spill] sm:$0xff] %v2546_v52  ;;  %427 = vmatpush.xpose.msra.mxu0 %v2546_v52  ;;  %615 = vmatpush.xpose.msra.mxu3 %v2546_v52  ;;  %v2561_v10 = vsub.f32 %v1857_v3, %v2546_v52  ;;  %v2580_v52 = vand.u32 4294901760, %v1859_v54  ;;  %1864 = vpow2.f32 %v350_v8  ;;  %v2614_v8 = vsub.f32 %v2076_v22, %v2396_v58 }
  0xcd   :  { %517 = vmatpush.xpose.msra.mxu1 %v516_v49  ;;  %v771_v30 = vsub.f32 %v2525_v53, %v3580_v5  ;;  %v2578_v49 = vsub.f32 %v1853_v9, %v2543_v26  ;;  %v1861_v5 = vpop.eup %1860  ;;  %v2593_v9 = vsub.f32 %v2058_v18, %v2359_v13  ;;  %v3582_v14 = vand.u32 4294901760, %v2556_v2 }
  0xce   :  { %578 = vmatpush.xpose.msra.mxu2 %v2561_v10  ;;  %v3517_v62 = vand.u32 4294901760, %v2561_v10  ;;  %v2607_v13 = vsub.f32 %v1859_v54, %v2580_v52  ;;  %1866 = vpow2.f32 %v348_v44  ;;  %v3585_v44 = vand.u32 4294901760, %v2232_v45 }
  0xcf   :  { %v772_v34 = vand.u32 4294901760, %v771_v30  ;;  %v782_v63 = vand.u32 4294901760, %v2578_v49  ;;  %v344_v22 = vmul.f32 1.442695, %v2614_v8  ;;  %v2632_v58 = vsub.f32 %v2104_v27, %v2442_v41  ;;  %v243_v27 = vpop.xlane.xlu1 %242 }
  0xd0   :  { %429 = vmatpush.xpose.msra.mxu0 %v2540_v39  ;;  %617 = vmatpush.xpose.msra.mxu3 %v2540_v39  ;;  %v521_v20 = vsub.f32 %v2561_v10, %v3517_v62  ;;  %v527_v62 = vsub.f32 %v2556_v2, %v3582_v14  ;;  %v346_v14 = vmul.f32 1.442695, %v2593_v9 }
  0xd1   :  { %v783_v54 = vsub.f32 %v2578_v49, %v782_v63 }
  0xd2   :  { %581 = vmatpush.xpose.msra.mxu2 %v2556_v2  ;;  %v522_v3 = vand.u32 4294901760, %v521_v20  ;;  %v1863_v20 = vpop.eup %1862  ;;  %v528_v30 = vand.u32 4294901760, %v527_v62  ;;  %1868 = vpow2.f32 %v346_v14 }
  0xd3   :  { %v1865_v62 = vpop.eup %1864  ;;  %1870 = vpow2.f32 %v344_v22  ;;  %v2663_v22 = vsub.f32 %v2112_v28, %v243_v27 }
  0xd4   :  { %625 = vmatpush.xpose.msrb.mxu0 %v3581_v50  ;;  %767 = vmatpush.xpose.msrb.mxu3 %v766_v12  ;;  %v2601_v12 = vand.u32 4294901760, %v1861_v5  ;;  %v3583_v50 = vand.u32 4294901760, %v2564_v19 }
  0xd5   :  { %523 = vmatpush.xpose.msra.mxu1 %v522_v3  ;;  %v2620_v3 = vand.u32 4294901760, %v1863_v20  ;;  %v338_v27 = vmul.f32 1.442695, %v2663_v22 }
  0xd6   :  { %727 = vmatpush.xpose.msrb.mxu2 %v2481_v4  ;;  %v777_v18 = vsub.f32 %v2564_v19, %v3583_v50  ;;  %v784_v50 = vand.u32 4294901760, %v783_v54  ;;  %v342_v54 = vmul.f32 1.442695, %v2632_v58 }
  0xd7   :  { %v2642_v14 = vsub.f32 %v1863_v20, %v2620_v3 }
  0xd8   :  { %629 = vmatpush.xpose.msrb.mxu0 %v3584_v15  ;;  %773 = vmatpush.xpose.msrb.mxu3 %v772_v34  ;;  %v778_v47 = vand.u32 4294901760, %v777_v18  ;;  %v3521_v15 = vand.u32 4294901760, %v2607_v13  ;;  %v2624_v34 = vsub.f32 %v1861_v5, %v2601_v12  ;;  %v1867_v18 = vpop.eup %1866  ;;  %v2635_v5 = vand.u32 4294901760, %v1865_v62 }
  0xd9   :  { %529 = vmatpush.xpose.msra.mxu1 %v528_v30  ;;  %v3586_v30 = vand.u32 4294901760, %v2252_v57  ;;  %v2647_v41 = vand.u32 4294901760, %v1867_v18  ;;  %v1869_v20 = vpop.eup %1868  ;;  %1872 = vpow2.f32 %v342_v54 }
  0xda   :  { %729 = vmatpush.xpose.msrb.mxu2 %v2502_v43  ;;  %v789_v45 = vsub.f32 %v2607_v13, %v3521_v15 }
  0xdc   :  { %633 = vmatpush.xpose.msrb.mxu0 %v3585_v44  ;;  %779 = vmatpush.xpose.msrb.mxu3 %v778_v47  ;;  %v2652_v47 = vsub.f32 %v2094_v25, %v2435_v17  ;;  %v790_v44 = vand.u32 4294901760, %v789_v45  ;;  %v2668_v25 = vand.u32 4294901760, %v1869_v20  ;;  %v2673_v45 = vsub.f32 %v1867_v18, %v2647_v41 }
  0xdd   :  { %691 = vmatpush.xpose.msrb.mxu1 %v2198_v61  ;;  %v3519_v61 = vand.u32 4294901760, %v2624_v34 }
  0xde   :  { %731 = vmatpush.xpose.msrb.mxu2 %v2535_v56  ;;  %v340_v17 = vmul.f32 1.442695, %v2652_v47  ;;  %v3524_v18 = vand.u32 4294901760, %v2673_v45 }
  0xdf   :  { %v795_v57 = vsub.f32 %v2624_v34, %v3519_v61 }
  0xe0   :  { %637 = vmatpush.xpose.msrb.mxu0 %v3586_v30  ;;  %785 = vmatpush.xpose.msrb.mxu3 %v784_v50  ;;  %v2660_v50 = vsub.f32 %v1865_v62, %v2635_v5  ;;  %v3587_v30 = vand.u32 4294901760, %v2286_v48  ;;  %v241_v62 = vpop.xlane.xlu0 %240  ;;  %1874 = vpow2.f32 %v340_v17  ;;  %v3589_v17 = vand.u32 4294901760, %v2326_v11 }
  0xe1   :  { %693 = vmatpush.xpose.msrb.mxu1 %v2229_v40  ;;  %v3520_v40 = vand.u32 4294901760, %v2642_v14  ;;  %v796_v61 = vand.u32 4294901760, %v795_v57  ;;  %v2681_v54 = vsub.f32 %v2135_v32, %v241_v62  ;;  %v2689_v57 = vsub.f32 %v1869_v20, %v2668_v25 }
  0xe2   :  { %733 = vmatpush.xpose.msrb.mxu2 %v2543_v26  ;;  %v806_v48 = vand.u32 4294901760, %v2660_v50  ;;  %1876 = vpow2.f32 %v338_v27  ;;  %v813_v20 = vsub.f32 %v2673_v45, %v3524_v18 }
  0xe3   :  { %v801_v28 = vsub.f32 %v2642_v14, %v3520_v40  ;;  %v239_v40 = vpop.xlane.xlu1 %238  ;;  %v3522_v62 = vand.u32 4294901760, %v2689_v57 }
  0xe4   :  { %641 = vmatpush.xpose.msrb.mxu0 %v3587_v30  ;;  %791 = vmatpush.xpose.msrb.mxu3 %v790_v44  ;;  %v3588_v44 = vand.u32 4294901760, %v2317_v36  ;;  %v807_v32 = vsub.f32 %v2660_v50, %v806_v48 }
  0xe5   :  { %695 = vmatpush.xpose.msrb.mxu1 %v2227_v38  ;;  %v1871_v38 = vpop.eup %1870  ;;  %v802_v15 = vand.u32 4294901760, %v801_v28 }
  0xe6   :  { %735 = vmatpush.xpose.msrb.mxu2 %v2580_v52  ;;  %v2691_v30 = vand.u32 4294901760, %v1871_v38  ;;  %v1873_v36 = vpop.eup %1872  ;;  %v808_v27 = vand.u32 4294901760, %v807_v32  ;;  %v814_v32 = vand.u32 4294901760, %v813_v20 }
  0xe7   :  { %v2708_v28 = vand.u32 4294901760, %v1873_v36 }
  0xe8   :  { %645 = vmatpush.xpose.msrb.mxu0 %v3588_v44  ;;  %797 = vmatpush.xpose.msrb.mxu3 %v796_v61  ;;  %v2698_v61 = vsub.f32 %v2130_v31, %v239_v40  ;;  %v2711_v31 = vsub.f32 %v1871_v38, %v2691_v30  ;;  %v1875_v40 = vpop.eup %1874  ;;  %v819_v38 = vsub.f32 %v2689_v57, %v3522_v62 }
  0xe9   :  { %697 = vmatpush.xpose.msrb.mxu1 %v2234_v46  ;;  %v336_v46 = vmul.f32 1.442695, %v2681_v54  ;;  %v1877_v44 = vpop.eup %1876 }
  0xea   :  { %737 = vmatpush.xpose.msrb.mxu2 %v2601_v12  ;;  %v334_v11 = vmul.f32 1.442695, %v2698_v61  ;;  %v2733_v20 = vand.u32 4294901760, %v1877_v44  ;;  %v820_v62 = vand.u32 4294901760, %v819_v38 }
  0xeb   :  { %1878 = vpow2.f32 %v336_v46  ;;  %v2723_v46 = vand.u32 4294901760, %v1875_v40 }
  0xec   :  { %649 = vmatpush.xpose.msrb.mxu0 %v3589_v17  ;;  %803 = vmatpush.xpose.msrb.mxu3 %v802_v15  ;;  %v3543_v15 = vmov 0.0   ;;  %1880 = vpow2.f32 %v334_v11  ;;  %v3591_v17 = vand.u32 4294901760, %v2390_v51 }
  0xed   :  { %699 = vmatpush.xpose.msrb.mxu1 %v2276_v37  ;;  %v3590_v37 = vand.u32 4294901760, %v2363_v16  ;;  %582 = vmatmul.f32.vlgmr.msra.gmra.mxu2 %v3543_v15  ;;  %v3523_v16 = vand.u32 4294901760, %v2711_v31  ;;  %v2742_v51 = vsub.f32 %v1875_v40, %v2723_v46 }
  0xee   :  { %739 = vmatpush.xpose.msrb.mxu2 %v2620_v3  ;;  %430 = vmatmul.f32.vlgmr.msra.gmra.mxu0 %v3543_v15 }
  0xef   :  { %618 = vmatmul.f32.vlgmr.msra.gmra.mxu3 %v3543_v15  ;;  %v836_v18 = vand.u32 4294901760, %v2742_v51 }
  0xf0   :  { %653 = vmatpush.xpose.msrb.mxu0 %v3590_v37  ;;  %809 = vmatpush.xpose.msrb.mxu3 %v808_v27  ;;  %v3538_v27 = vmov 1.0  }
  0xf1   :  { %701 = vmatpush.xpose.msrb.mxu1 %v2308_v35  ;;  %v2727_v35 = vsub.f32 %v1873_v36, %v2708_v28  ;;  %v1879_v37 = vpop.eup %1878  ;;  %v825_v36 = vsub.f32 %v2711_v31, %v3523_v16 }
  0xf2   :  { %741 = vmatpush.xpose.msrb.mxu2 %v2635_v5  ;;  %530 = vmatmul.f32.vlgmr.msra.gmra.mxu1 %v3538_v27  ;;  %v1881_v38 = vpop.eup %1880 }
  0xf3   :  { %v830_v11 = vand.u32 4294901760, %v2727_v35  ;;  %v826_v16 = vand.u32 4294901760, %v825_v36 }
  0xf4   :  { %657 = vmatpush.xpose.msrb.mxu0 %v3591_v17  ;;  %815 = vmatpush.xpose.msrb.mxu3 %v814_v32  ;;  %v2747_v32 = vand.u32 4294901760, %v1879_v37  ;;  %v2750_v17 = vsub.f32 %v1877_v44, %v2733_v20 }
  0xf5   :  { %703 = vmatpush.xpose.msrb.mxu1 %v2313_v60  ;;  %v3592_v60 = vand.u32 4294901760, %v2399_v21  ;;  %v831_v40 = vsub.f32 %v2727_v35, %v830_v11  ;;  %v3593_v21 = vand.u32 4294901760, %v2439_v23  ;;  %v3594_v23 = vand.u32 4294901760, %v2475_v6 }
  0xf6   :  { %743 = vmatpush.xpose.msrb.mxu2 %v2647_v41  ;;  %v2764_v44 = vsub.f32 %v1879_v37, %v2747_v32 }
  0xf7   :  { %v832_v36 = vand.u32 4294901760, %v831_v40 }
  0xf8   :  { %661 = vmatpush.xpose.msrb.mxu0 %v3592_v60  ;;  %821 = vmatpush.xpose.msrb.mxu3 %v820_v62  ;;  %v842_v62 = vand.u32 4294901760, %v2750_v17  ;;  %v837_v60 = vsub.f32 %v2742_v51, %v836_v18 }
  0xf9   :  { %705 = vmatpush.xpose.msrb.mxu1 %v2354_v33  ;;  %v2760_v33 = vand.u32 4294901760, %v1881_v38 }
  0xfa   :  { %745 = vmatpush.xpose.msrb.mxu2 %v2668_v25  ;;  %v838_v40 = vand.u32 4294901760, %v837_v60  ;;  %v3597_v60 = vand.u32 4294901760, %v2561_v10  ;;  %v3600_v10 = vand.u32 4294901760, %v2510_v42 }
  0xfb   :  { %v2778_v37 = vsub.f32 %v1881_v38, %v2760_v33  ;;  %v3596_v38 = vand.u32 4294901760, %v2521_v29  ;;  %v3598_v29 = vand.u32 4294901760, %v2556_v2  ;;  %v3602_v2 = vand.u32 4294901760, %v2525_v53 }
  0xfc   :  { %665 = vmatpush.xpose.msrb.mxu0 %v3593_v21  ;;  %827 = vmatpush.xpose.msrb.mxu3 %v826_v16  ;;  %v848_v16 = vand.u32 4294901760, %v2764_v44  ;;  %v3595_v21 = vand.u32 4294901760, %v2479_v1 }
  0xfd   :  { %707 = vmatpush.xpose.msrb.mxu1 %v2383_v7  ;;  %v843_v7 = vsub.f32 %v2750_v17, %v842_v62 }
  0xfe   :  { %747 = vmatpush.xpose.msrb.mxu2 %v2691_v30  ;;  %v849_v6 = vsub.f32 %v2764_v44, %v848_v16 }
 0x100   :  { %669 = vmatpush.xpose.msrb.mxu0 %v3594_v23  ;;  %833 = vmatpush.xpose.msrb.mxu3 %v832_v36  ;;  %v854_v36 = vand.u32 4294901760, %v2778_v37  ;;  %v850_v1 = vand.u32 4294901760, %v849_v6 }
 0x101   :  { %709 = vmatpush.xpose.msrb.mxu1 %v2385_v59  ;;  %v844_v59 = vand.u32 4294901760, %v843_v7 }
 0x102   :  { %749 = vmatpush.xpose.msrb.mxu2 %v2708_v28 }
 0x104   :  { %673 = vmatpush.xpose.msrb.mxu0 %v3595_v21  ;;  %839 = vmatpush.xpose.msrb.mxu3 %v838_v40 }
 0x105   :  { %711 = vmatpush.xpose.msrb.mxu1 %v2432_v55  ;;  %v855_v55 = vsub.f32 %v2778_v37, %v854_v36 }
 0x106   :  { %751 = vmatpush.xpose.msrb.mxu2 %v2723_v46 }
 0x107   :  { %v856_v23 = vand.u32 4294901760, %v855_v55 }
 0x108   :  { %677 = vmatpush.xpose.msrb.mxu0 %v3596_v38  ;;  %845 = vmatpush.xpose.msrb.mxu3 %v844_v59  ;;  %v3615_v59 = vld [vmem:[#allocation11_spill] sm:$0xff] }
 0x109   :  { %713 = vmatpush.xpose.msrb.mxu1 %v2467_v0  ;;  %v3599_v0 = vld [vmem:[#allocation27_spill] sm:$0xff] }
 0x10a   :  { %753 = vmatpush.xpose.msrb.mxu2 %v2733_v20 }
 0x10c   :  { %681 = vmatpush.xpose.msrb.mxu0 %v3597_v60  ;;  %851 = vmatpush.xpose.msrb.mxu3 %v850_v1 }
 0x10d   :  { %715 = vmatpush.xpose.msrb.mxu1 %v2470_v24  ;;  %v3601_v24 = vld [vmem:[#allocation29_spill] sm:$0xff] }
 0x10e   :  { %755 = vmatpush.xpose.msrb.mxu2 %v2747_v32 }
 0x110   :  { %685 = vmatpush.xpose.msrb.mxu0 %v3598_v29  ;;  %857 = vmatpush.xpose.msrb.mxu3 %v856_v23  ;;  %v3616_v29 = vld [vmem:[#allocation10_spill] sm:$0xff] }
 0x111   :  { %717 = vmatpush.xpose.msrb.mxu1 %v3599_v0 }
 0x112   :  { %757 = vmatpush.xpose.msrb.mxu2 %v2760_v33 }
 0x113   :  { %686 = vmatmul.f32.vlgmr.msrb.gmra.mxu0 %v3538_v27  ;;  %858 = vmatmul.f32.vlgmr.msrb.gmra.mxu3 %v3538_v27 }
 0x114   :  { %864 = vmatpush.xpose.msra.mxu0 %v2510_v42  ;;  %1019 = vmatpush.xpose.msra.mxu3 %v2481_v4  ;;  %v3603_v42 = vand.u32 4294901760, %v2564_v19 }
 0x115   :  { %719 = vmatpush.xpose.msrb.mxu1 %v3601_v24  ;;  %758 = vmatmul.f32.vlgmr.msrb.gmra.mxu2 %v3543_v15 }
 0x116   :  { %953 = vmatpush.xpose.msra.mxu2 %v3600_v10 }
 0x118   :  { %867 = vmatpush.xpose.msra.mxu0 %v2525_v53  ;;  %1021 = vmatpush.xpose.msra.mxu3 %v2502_v43  ;;  %v3525_v53 = vlaneseq }
 0x119   :  { %721 = vmatpush.xpose.msrb.mxu1 %v2540_v39  ;;  %v3608_v39 = vand.u32 4294901760, %v2689_v57 }
 0x11a   :  { %957 = vmatpush.xpose.msra.mxu2 %v3602_v2 }
 0x11c   :  { %870 = vmatpush.xpose.msra.mxu0 %v2564_v19  ;;  %1023 = vmatpush.xpose.msra.mxu3 %v2535_v56  ;;  %v3605_v19 = vand.u32 4294901760, %v2624_v34 }
 0x11d   :  { %915 = vmatpush.xpose.msra.mxu1 %v2481_v4  ;;  %v3604_v4 = vand.u32 4294901760, %v2607_v13 }
 0x11e   :  { %722 = vmatmul.f32.vlgmr.msrb.gmra.mxu1 %v3538_v27  ;;  %961 = vmatpush.xpose.msra.mxu2 %v3603_v42 }
 0x120   :  { %873 = vmatpush.xpose.msra.mxu0 %v2578_v49  ;;  %1025 = vmatpush.xpose.msra.mxu3 %v2543_v26  ;;  %v3609_v49 = vand.u32 4294901760, %v2711_v31 }
 0x121   :  { %917 = vmatpush.xpose.msra.mxu1 %v2502_v43  ;;  %v125_v43 = vpop.permute.xlu2 %124 }
 0x122   :  { %965 = vmatpush.xpose.msra.mxu2 %v782_v63 }
 0x124   :  { %876 = vmatpush.xpose.msra.mxu0 %v2607_v13  ;;  %1027 = vmatpush.xpose.msra.mxu3 %v2580_v52  ;;  %v3610_v13 = vld [vmem:[#allocation5_spill] sm:$0xff] }
 0x125   :  { %919 = vmatpush.xpose.msra.mxu1 %v2535_v56  ;;  %v3606_v56 = vand.u32 4294901760, %v2642_v14 }
 0x126   :  { %969 = vmatpush.xpose.msra.mxu2 %v3604_v4 }
 0x128   :  { %879 = vmatpush.xpose.msra.mxu0 %v2624_v34  ;;  %1029 = vmatpush.xpose.msra.mxu3 %v2601_v12  ;;  %v119_v34 = vpop.permute.xlu1 %118 }
 0x129   :  { %921 = vmatpush.xpose.msra.mxu1 %v2543_v26  ;;  %v2861_v26 = vand.u32 127, %v3525_v53  ;;  %v116_v63 = vpop.permute.xlu2 %115 }
 0x12a   :  { %973 = vmatpush.xpose.msra.mxu2 %v3605_v19 }
 0x12b   :  { %vm189_vm0 = vcmp.eq.s32.totalorder %v2861_v26, %v125_v43  ;;  %vm187_vm2 = vcmp.eq.s32.totalorder %v2861_v26, %v119_v34  ;;  %vm186_vm3 = vcmp.eq.s32.totalorder %v2861_v26, %v116_v63 }
 0x12c   :  { %882 = vmatpush.xpose.msra.mxu0 %v2642_v14  ;;  %1031 = vmatpush.xpose.msra.mxu3 %v2620_v3  ;;  %v3611_v14 = vld [vmem:[#allocation8_spill] sm:$0xff] }
 0x12d   :  { %923 = vmatpush.xpose.msra.mxu1 %v2580_v52  ;;  %v3607_v52 = vand.u32 4294901760, %v2673_v45 }
 0x12e   :  { %977 = vmatpush.xpose.msra.mxu2 %v3606_v56  ;;  %v3617_v56 = vld [vmem:[#allocation12_spill] sm:$0xff] }
 0x130   :  { %885 = vmatpush.xpose.msra.mxu0 %v2660_v50  ;;  %1033 = vmatpush.xpose.msra.mxu3 %v2635_v5 }
 0x131   :  { %925 = vmatpush.xpose.msra.mxu1 %v2601_v12  ;;  %v122_v12 = vpop.permute.xlu0 %121  ;;  %v113_v50 = vpop.permute.xlu2 %112 }
 0x132   :  { %981 = vmatpush.xpose.msra.mxu2 %v806_v48  ;;  %vm188_vm1 = vcmp.eq.s32.totalorder %v2861_v26, %v122_v12  ;;  %v3612_v48 = vld [vmem:[#allocation6_spill] sm:$0xff]  ;;  %vm185_vm4 = vcmp.eq.s32.totalorder %v2861_v26, %v113_v50 }
 0x133   :  { %v3618_v12 = vld [vmem:[#allocation14_spill] sm:$0xff] }
 0x134   :  { %888 = vmatpush.xpose.msra.mxu0 %v2673_v45  ;;  %1035 = vmatpush.xpose.msra.mxu3 %v2647_v41 }
 0x135   :  { %927 = vmatpush.xpose.msra.mxu1 %v2620_v3  ;;  %v381_v3 = vsel %vm189_vm0, %v3610_v13, 0.0 }
 0x136   :  { %985 = vmatpush.xpose.msra.mxu2 %v3607_v52 }
 0x138   :  { %891 = vmatpush.xpose.msra.mxu0 %v2689_v57  ;;  %1037 = vmatpush.xpose.msra.mxu3 %v2668_v25  ;;  %v110_v57 = vpop.permute.xlu1 %109 }
 0x139   :  { %929 = vmatpush.xpose.msra.mxu1 %v2635_v5  ;;  %v2879_v5 = vand.u32 4294901760, %v381_v3  ;;  %vm184_vm5 = vcmp.eq.s32.totalorder %v2861_v26, %v110_v57  ;;  %v101_v55 = vpop.permute.xlu0 %100 }
 0x13a   :  { %989 = vmatpush.xpose.msra.mxu2 %v3608_v39  ;;  %v376_v6 = vsel %vm184_vm5, %v3615_v59, 0.0  ;;  %vm181_vm8 = vcmp.eq.s32.totalorder %v2861_v26, %v101_v55  ;;  %v3620_v59 = vld [vmem:[#allocation15_spill] sm:$0xff] }
 0x13b   :  { %v2952_v60 = vand.u32 4294901760, %v376_v6  ;;  %v373_v13 = vsel %vm181_vm8, %v3618_v12, 0.0 }
 0x13c   :  { %894 = vmatpush.xpose.msra.mxu0 %v2711_v31  ;;  %1039 = vmatpush.xpose.msra.mxu3 %v2691_v30 }
 0x13d   :  { %931 = vmatpush.xpose.msra.mxu1 %v2647_v41  ;;  %v380_v41 = vsel %vm188_vm1, %v3611_v14, 0.0  ;;  %v2970_v4 = vsub.f32 %v376_v6, %v2952_v60 }
 0x13e   :  { %993 = vmatpush.xpose.msra.mxu2 %v3609_v49  ;;  %v2891_v45 = vand.u32 4294901760, %v380_v41 }
 0x13f   :  { %v3533_v34 = vand.u32 4294901760, %v2970_v4 }
 0x140   :  { %897 = vmatpush.xpose.msra.mxu0 %v2727_v35  ;;  %1041 = vmatpush.xpose.msra.mxu3 %v2708_v28  ;;  %v2903_v35 = vsub.f32 %v380_v41, %v2891_v45  ;;  %v2990_v41 = vand.u32 4294901760, %v373_v13 }
 0x141   :  { %933 = vmatpush.xpose.msra.mxu1 %v2668_v25  ;;  %v2889_v25 = vsub.f32 %v381_v3, %v2879_v5  ;;  %v92_v14 = vpop.permute.xlu0 %91 }
 0x142   :  { %997 = vmatpush.xpose.msra.mxu2 %v830_v11  ;;  %v3541_v7 = vand.u32 4294901760, %v2903_v35  ;;  %vm178_vm11 = vcmp.eq.s32.totalorder %v2861_v26, %v92_v14 }
 0x144   :  { %900 = vmatpush.xpose.msra.mxu0 %v2742_v51  ;;  %1043 = vmatpush.xpose.msra.mxu3 %v2723_v46 }
 0x145   :  { %935 = vmatpush.xpose.msra.mxu1 %v2691_v30  ;;  %v1092_v30 = vand.u32 4294901760, %v2889_v25 }
 0x146   :  { %1001 = vmatpush.xpose.msra.mxu2 %v836_v18  ;;  %v379_v18 = vsel %vm187_vm2, %v3612_v48, 0.0  ;;  %v3619_v48 = vld [vmem:[#allocation13_spill] sm:$0xff] }
 0x147   :  { %v2905_v11 = vand.u32 4294901760, %v379_v18  ;;  %v1093_v51 = vsub.f32 %v2889_v25, %v1092_v30 }
 0x148   :  { %903 = vmatpush.xpose.msra.mxu0 %v2750_v17  ;;  %1045 = vmatpush.xpose.msra.mxu3 %v2733_v20  ;;  %v3614_v17 = vld [vmem:[#allocation9_spill] sm:$0xff] }
 0x149   :  { %937 = vmatpush.xpose.msra.mxu1 %v2708_v28  ;;  %v3613_v28 = vld [vmem:[#allocation7_spill] sm:$0xff]  ;;  %v1094_v40 = vand.u32 4294901760, %v1093_v51 }
 0x14a   :  { %1005 = vmatpush.xpose.msra.mxu2 %v842_v62  ;;  %v378_v31 = vsel %vm186_vm3, %v3613_v28, 0.0  ;;  %v377_v62 = vsel %vm185_vm4, %v3614_v17, 0.0  ;;  %v3005_v17 = vsub.f32 %v373_v13, %v2990_v41 }
 0x14c   :  { %906 = vmatpush.xpose.msra.mxu0 %v2764_v44  ;;  %1047 = vmatpush.xpose.msra.mxu3 %v2747_v32  ;;  %v2922_v44 = vsub.f32 %v379_v18, %v2905_v11 }
 0x14d   :  { %939 = vmatpush.xpose.msra.mxu1 %v2723_v46  ;;  %v2912_v46 = vand.u32 4294901760, %v378_v31 }
 0x14e   :  { %1009 = vmatpush.xpose.msra.mxu2 %v848_v16  ;;  %v3540_v21 = vand.u32 4294901760, %v2922_v44 }
 0x14f   :  { %v2933_v16 = vsub.f32 %v378_v31, %v2912_v46  ;;  %v1123_v31 = vsub.f32 %v2970_v4, %v3533_v34 }
 0x150   :  { %909 = vmatpush.xpose.msra.mxu0 %v2778_v37  ;;  %1049 = vmatpush.xpose.msra.mxu3 %v2760_v33  ;;  %v2935_v37 = vand.u32 4294901760, %v377_v62  ;;  %v1105_v23 = vsub.f32 %v2922_v44, %v3540_v21 }
 0x151   :  { %941 = vmatpush.xpose.msra.mxu1 %v2733_v20  ;;  %v107_v20 = vpop.permute.xlu2 %106  ;;  %v3535_v1 = vand.u32 4294901760, %v2933_v16 }
 0x152   :  { %1013 = vmatpush.xpose.msra.mxu2 %v854_v36  ;;  %v104_v36 = vpop.permute.xlu1 %103  ;;  %vm183_vm6 = vcmp.eq.s32.totalorder %v2861_v26, %v107_v20  ;;  %v2948_v38 = vsub.f32 %v377_v62, %v2935_v37  ;;  %v1106_v19 = vand.u32 4294901760, %v1105_v23  ;;  %v1124_v20 = vand.u32 4294901760, %v1123_v31  ;;  %v3621_v23 = vld [vmem:[#allocation18_spill] sm:$0xff] }
 0x153   :  { %910 = vmatmul.f32.vlgmr.msra.gmra.mxu0 %v3543_v15  ;;  %1050 = vmatmul.f32.vlgmr.msra.gmra.mxu3 %v3538_v27  ;;  %v375_v0 = vsel %vm183_vm6, %v3616_v29, 0.0  ;;  %vm182_vm7 = vcmp.eq.s32.totalorder %v2861_v26, %v104_v36  ;;  %v1111_v24 = vsub.f32 %v2933_v16, %v3535_v1  ;;  %v370_v29 = vsel %vm178_vm11, %v3621_v23, 0.0  ;;  %v3624_v23 = vld [vmem:[#allocation16_spill] sm:$0xff] }
 0x154   :  { %1055 = vmatpush.xpose.msrb.mxu0 %v2879_v5  ;;  %1243 = vmatpush.xpose.msrb.mxu3 %v2879_v5  ;;  %v3534_v2 = vand.u32 4294901760, %v2948_v38  ;;  %v2967_v42 = vand.u32 4294901760, %v375_v0  ;;  %v374_v43 = vsel %vm182_vm7, %v3617_v56, 0.0 }
 0x155   :  { %943 = vmatpush.xpose.msra.mxu1 %v2747_v32  ;;  %1014 = vmatmul.f32.vlgmr.msra.gmra.mxu2 %v3538_v27  ;;  %v1099_v32 = vsub.f32 %v2903_v35, %v3541_v7  ;;  %v1112_v39 = vand.u32 4294901760, %v1111_v24  ;;  %v2984_v3 = vand.u32 4294901760, %v374_v43  ;;  %v3633_v7 = vld [vmem:[#allocation26_spill] sm:$0xff] }
 0x156   :  { %1192 = vmatpush.xpose.msrb.mxu2 %v2889_v25  ;;  %v1117_v49 = vsub.f32 %v2948_v38, %v3534_v2  ;;  %v2981_v63 = vsub.f32 %v375_v0, %v2967_v42  ;;  %v173_v0 = vpop.permute.xlu0 %172  ;;  %v3632_v2 = vld [vmem:[#allocation24_spill] sm:$0xff] }
 0x157   :  { %v2995_v57 = vsub.f32 %v374_v43, %v2984_v3  ;;  %v3032_v43 = vand.u32 4294901760, %v370_v29  ;;  %vm205_vm14 = vcmp.eq.s32.totalorder %v2861_v26, %v173_v0 }
 0x158   :  { %1057 = vmatpush.xpose.msrb.mxu0 %v2891_v45  ;;  %1245 = vmatpush.xpose.msrb.mxu3 %v2891_v45  ;;  %v1118_v50 = vand.u32 4294901760, %v1117_v49  ;;  %v3532_v51 = vand.u32 4294901760, %v2981_v63 }
 0x159   :  { %945 = vmatpush.xpose.msra.mxu1 %v2760_v33  ;;  %v1100_v33 = vand.u32 4294901760, %v1099_v32  ;;  %v98_v10 = vpop.permute.xlu2 %97  ;;  %v3530_v32 = vand.u32 4294901760, %v2995_v57 }
 0x15a   :  { %1195 = vmatpush.xpose.msrb.mxu2 %v2903_v35  ;;  %v95_v52 = vpop.permute.xlu1 %94  ;;  %vm180_vm9 = vcmp.eq.s32.totalorder %v2861_v26, %v98_v10 }
 0x15b   :  { %v372_v18 = vsel %vm180_vm9, %v3619_v48, 0.0  ;;  %vm179_vm10 = vcmp.eq.s32.totalorder %v2861_v26, %v95_v52 }
 0x15c   :  { %1059 = vmatpush.xpose.msrb.mxu0 %v2905_v11  ;;  %1247 = vmatpush.xpose.msrb.mxu3 %v2905_v11  ;;  %v3007_v62 = vand.u32 4294901760, %v372_v18  ;;  %v371_v6 = vsel %vm179_vm10, %v3620_v59, 0.0 }
 0x15d   :  { %1095 = vmatpush.xpose.msrb.mxu1 %v1094_v40  ;;  %v1129_v40 = vsub.f32 %v2981_v63, %v3532_v51  ;;  %v3024_v10 = vand.u32 4294901760, %v371_v6 }
 0x15e   :  { %946 = vmatmul.f32.vlgmr.msra.gmra.mxu1 %v3543_v15  ;;  %1198 = vmatpush.xpose.msrb.mxu2 %v2922_v44  ;;  %v3019_v55 = vsub.f32 %v372_v18, %v3007_v62 }
 0x15f   :  { %v1130_v24 = vand.u32 4294901760, %v1129_v40  ;;  %v3040_v12 = vsub.f32 %v371_v6, %v3024_v10  ;;  %v3623_v40 = vld [vmem:[#allocation20_spill] sm:$0xff]  ;;  %v80_v6 = vpop.permute.xlu0 %79 }
 0x160   :  { %1061 = vmatpush.xpose.msrb.mxu0 %v2912_v46  ;;  %1249 = vmatpush.xpose.msrb.mxu3 %v2912_v46  ;;  %v3527_v14 = vand.u32 4294901760, %v3019_v55  ;;  %vm174_vm1 = vcmp.eq.s32.totalorder %v2861_v26, %v80_v6 }
 0x161   :  { %1101 = vmatpush.xpose.msrb.mxu1 %v1100_v33  ;;  %v89_v28 = vpop.permute.xlu2 %88  ;;  %v3528_v33 = vand.u32 4294901760, %v3005_v17 }
 0x162   :  { %1201 = vmatpush.xpose.msrb.mxu2 %v2933_v16  ;;  %v86_v36 = vpop.permute.xlu1 %85  ;;  %vm177_vm12 = vcmp.eq.s32.totalorder %v2861_v26, %v89_v28  ;;  %v1147_v31 = vsub.f32 %v3019_v55, %v3527_v14 }
 0x163   :  { %v1141_v52 = vsub.f32 %v3005_v17, %v3528_v33  ;;  %vm176_vm13 = vcmp.eq.s32.totalorder %v2861_v26, %v86_v36 }
 0x164   :  { %1063 = vmatpush.xpose.msrb.mxu0 %v2935_v37  ;;  %1251 = vmatpush.xpose.msrb.mxu3 %v2935_v37  ;;  %v368_v59 = vsel %vm176_vm13, %v3623_v40, 0.0 }
 0x165   :  { %1107 = vmatpush.xpose.msrb.mxu1 %v1106_v19  ;;  %v1135_v19 = vsub.f32 %v2995_v57, %v3530_v32  ;;  %v1142_v28 = vand.u32 4294901760, %v1141_v52 }
 0x166   :  { %1204 = vmatpush.xpose.msrb.mxu2 %v2948_v38 }
 0x167   :  { %v1136_v13 = vand.u32 4294901760, %v1135_v19 }
 0x168   :  { %1065 = vmatpush.xpose.msrb.mxu0 %v2952_v60  ;;  %1253 = vmatpush.xpose.msrb.mxu3 %v2952_v60 }
 0x169   :  { %1113 = vmatpush.xpose.msrb.mxu1 %v1112_v39  ;;  %v83_v56 = vpop.permute.xlu2 %82  ;;  %v3622_v39 = vld [vmem:[#allocation17_spill] sm:$0xff] }
 0x16a   :  { %1207 = vmatpush.xpose.msrb.mxu2 %v2970_v4  ;;  %v369_v49 = vsel %vm177_vm12, %v3622_v39, 0.0  ;;  %v170_v18 = vpop.permute.xlu1 %169  ;;  %vm175_vm15 = vcmp.eq.s32.totalorder %v2861_v26, %v83_v56  ;;  %v1148_v56 = vand.u32 4294901760, %v1147_v31  ;;  %v3625_v39 = vld [vmem:[#allocation25_spill] sm:$0xff] }
 0x16b   :  { %v3049_v48 = vand.u32 4294901760, %v369_v49  ;;  %vm204_vm0 = vcmp.eq.s32.totalorder %v2861_v26, %v170_v18 }
 0x16c   :  { %1067 = vmatpush.xpose.msrb.mxu0 %v2967_v42  ;;  %1255 = vmatpush.xpose.msrb.mxu3 %v2967_v42 }
 0x16d   :  { %1119 = vmatpush.xpose.msrb.mxu1 %v1118_v50  ;;  %v3047_v50 = vsub.f32 %v370_v29, %v3032_v43  ;;  %v3062_v36 = vsub.f32 %v369_v49, %v3049_v48  ;;  %v397_v29 = vsel %vm205_vm14, %v3624_v23, 0.0  ;;  %v367_v49 = vsel %vm175_vm15, %v3625_v39, 0.0 }
 0x16e   :  { %1210 = vmatpush.xpose.msrb.mxu2 %v2981_v63  ;;  %v3086_v23 = vand.u32 4294901760, %v367_v49 }
 0x16f   :  { %v3529_v0 = vand.u32 4294901760, %v3047_v50  ;;  %v3531_v40 = vand.u32 4294901760, %v3062_v36 }
 0x170   :  { %1069 = vmatpush.xpose.msrb.mxu0 %v2984_v3  ;;  %1257 = vmatpush.xpose.msrb.mxu3 %v2984_v3 }
 0x171   :  { %1125 = vmatpush.xpose.msrb.mxu1 %v1124_v20  ;;  %v3526_v20 = vand.u32 4294901760, %v3040_v12  ;;  %v167_v19 = vpop.permute.xlu2 %166  ;;  %v1159_v31 = vsub.f32 %v3047_v50, %v3529_v0 }
 0x172   :  { %1213 = vmatpush.xpose.msrb.mxu2 %v2995_v57  ;;  %vm203_vm2 = vcmp.eq.s32.totalorder %v2861_v26, %v167_v19  ;;  %v164_v53 = vpop.permute.xlu1 %163 }
 0x173   :  { %v1153_v52 = vsub.f32 %v3040_v12, %v3526_v20  ;;  %v3628_v20 = vld [vmem:[#allocation21_spill] sm:$0xff]  ;;  %vm202_vm3 = vcmp.eq.s32.totalorder %v2861_v26, %v164_v53 }
 0x174   :  { %1071 = vmatpush.xpose.msrb.mxu0 %v2990_v41  ;;  %1259 = vmatpush.xpose.msrb.mxu3 %v2990_v41  ;;  %v395_v14 = vsel %vm203_vm2, %v3628_v20, 0.0 }
 0x175   :  { %1131 = vmatpush.xpose.msrb.mxu1 %v1130_v24  ;;  %v3067_v24 = vand.u32 4294901760, %v368_v59  ;;  %v1154_v6 = vand.u32 4294901760, %v1153_v52  ;;  %v1165_v52 = vsub.f32 %v3062_v36, %v3531_v40 }
 0x176   :  { %1216 = vmatpush.xpose.msrb.mxu2 %v3005_v17 }
 0x177   :  { %v3089_v39 = vsub.f32 %v368_v59, %v3067_v24  ;;  %v1160_v59 = vand.u32 4294901760, %v1159_v31  ;;  %v1166_v51 = vand.u32 4294901760, %v1165_v52 }
 0x178   :  { %1073 = vmatpush.xpose.msrb.mxu0 %v3007_v62  ;;  %1261 = vmatpush.xpose.msrb.mxu3 %v3007_v62 }
 0x179   :  { %1137 = vmatpush.xpose.msrb.mxu1 %v1136_v13  ;;  %v3075_v13 = vand.u32 4294901760, %v397_v29  ;;  %v3537_v20 = vand.u32 4294901760, %v3089_v39 }
 0x17a   :  { %1219 = vmatpush.xpose.msrb.mxu2 %v3019_v55  ;;  %v155_v27 = vpop.permute.xlu1 %154 }
 0x17b   :  { %vm199_vm6 = vcmp.eq.s32.totalorder %v2861_v26, %v155_v27 }
 0x17c   :  { %1075 = vmatpush.xpose.msrb.mxu0 %v3024_v10  ;;  %1263 = vmatpush.xpose.msrb.mxu3 %v3024_v10 }
 0x17d   :  { %1143 = vmatpush.xpose.msrb.mxu1 %v1142_v28  ;;  %v3626_v28 = vld [vmem:[#allocation19_spill] sm:$0xff] }
 0x17e   :  { %1222 = vmatpush.xpose.msrb.mxu2 %v3040_v12  ;;  %v396_v18 = vsel %vm204_vm0, %v3626_v28, 0.0  ;;  %v3094_v28 = vsub.f32 %v397_v29, %v3075_v13  ;;  %v161_v29 = vpop.permute.xlu0 %160 }
 0x17f   :  { %v3097_v33 = vand.u32 4294901760, %v396_v18  ;;  %vm201_vm4 = vcmp.eq.s32.totalorder %v2861_v26, %v161_v29  ;;  %v158_v29 = vpop.permute.xlu2 %157 }
 0x180   :  { %1077 = vmatpush.xpose.msrb.mxu0 %v3032_v43  ;;  %1265 = vmatpush.xpose.msrb.mxu3 %v3032_v43  ;;  %v3536_v31 = vand.u32 4294901760, %v3094_v28  ;;  %vm200_vm5 = vcmp.eq.s32.totalorder %v2861_v26, %v158_v29 }
 0x181   :  { %1149 = vmatpush.xpose.msrb.mxu1 %v1148_v56  ;;  %v3627_v56 = vld [vmem:[#allocation23_spill] sm:$0xff]  ;;  %v3116_v32 = vsub.f32 %v396_v18, %v3097_v33  ;;  %v1171_v18 = vsub.f32 %v3089_v39, %v3537_v20 }
 0x182   :  { %1225 = vmatpush.xpose.msrb.mxu2 %v3047_v50  ;;  %v366_v19 = vsel %vm174_vm1, %v3627_v56, 0.0  ;;  %v3105_v56 = vsub.f32 %v367_v49, %v3086_v23  ;;  %v3630_v49 = vld [vmem:[#allocation22_spill] sm:$0xff] }
 0x183   :  { %v3107_v0 = vand.u32 4294901760, %v366_v19  ;;  %v394_v40 = vsel %vm202_vm3, %v3630_v49, 0.0  ;;  %v1421_v49 = vsub.f32 %v3094_v28, %v3536_v31  ;;  %v3545_v52 = vand.u32 4294901760, %v3116_v32 }
 0x184   :  { %1079 = vmatpush.xpose.msrb.mxu0 %v3049_v48  ;;  %1267 = vmatpush.xpose.msrb.mxu3 %v3049_v48  ;;  %v3542_v34 = vand.u32 4294901760, %v3105_v56  ;;  %v3137_v1 = vand.u32 4294901760, %v394_v40 }
 0x185   :  { %1155 = vmatpush.xpose.msrb.mxu1 %v1154_v6  ;;  %3629 = vst [vmem:[#allocation27_spill] sm:$0xff] %v3107_v0  ;;  %v3112_v6 = vand.u32 4294901760, %v395_v14  ;;  %v3123_v53 = vsub.f32 %v366_v19, %v3107_v0  ;;  %v393_v19 = vsel %vm201_vm4, %v3632_v2, 0.0  ;;  %v1422_v29 = vand.u32 4294901760, %v1421_v49 }
 0x186   :  { %1228 = vmatpush.xpose.msrb.mxu2 %v3062_v36  ;;  %v1177_v31 = vsub.f32 %v3105_v56, %v3542_v34  ;;  %v3148_v20 = vand.u32 4294901760, %v393_v19  ;;  %v3152_v21 = vsub.f32 %v394_v40, %v3137_v1  ;;  %v392_v34 = vsel %vm200_vm5, %v3633_v7, 0.0  ;;  %v152_v15 = vpop.permute.xlu0 %151 }
 0x187   :  { %v3547_v2 = vand.u32 4294901760, %v3123_v53  ;;  %v3175_v27 = vand.u32 4294901760, %v392_v34  ;;  %vm198_vm7 = vcmp.eq.s32.totalorder %v2861_v26, %v152_v15 }
 0x188   :  { %1081 = vmatpush.xpose.msrb.mxu0 %v3067_v24  ;;  %1269 = vmatpush.xpose.msrb.mxu3 %v3067_v24  ;;  %v1178_v40 = vand.u32 4294901760, %v1177_v31 }
 0x189   :  { %1161 = vmatpush.xpose.msrb.mxu1 %v1160_v59  ;;  %v3131_v59 = vsub.f32 %v395_v14, %v3112_v6  ;;  %v1172_v14 = vand.u32 4294901760, %v1171_v18  ;;  %v1427_v18 = vsub.f32 %v3116_v32, %v3545_v52  ;;  %v1183_v49 = vsub.f32 %v3123_v53, %v3547_v2 }
 0x18a   :  { %1231 = vmatpush.xpose.msrb.mxu2 %v3089_v39  ;;  %v3636_v52 = vand.u32 4294901760, %v2903_v35  ;;  %v3187_v31 = vsub.f32 %v392_v34, %v3175_v27  ;;  %v3638_v35 = vand.u32 4294901760, %v3152_v21  ;;  %v146_v34 = vpop.permute.xlu1 %145 }
 0x18b   :  { %3631 = vst [vmem:[#allocation29_spill] sm:$0xff] %v3131_v59  ;;  %v1428_v7 = vand.u32 4294901760, %v1427_v18  ;;  %v1184_v2 = vand.u32 4294901760, %v1183_v49  ;;  %v3639_v49 = vand.u32 4294901760, %v2922_v44  ;;  %vm196_vm9 = vcmp.eq.s32.totalorder %v2861_v26, %v146_v34 }
 0x18c   :  { %1083 = vmatpush.xpose.msrb.mxu0 %v3086_v23  ;;  %1271 = vmatpush.xpose.msrb.mxu3 %v3086_v23  ;;  %v3643_v34 = vand.u32 4294901760, %v2948_v38 }
 0x18d   :  { %1167 = vmatpush.xpose.msrb.mxu1 %v1166_v51  ;;  %v3546_v51 = vand.u32 4294901760, %v3131_v59 }
 0x18e   :  { %1234 = vmatpush.xpose.msrb.mxu2 %v3105_v56 }
 0x18f   :  { %v1433_v25 = vsub.f32 %v3131_v59, %v3546_v51  ;;  %v149_v51 = vpop.permute.xlu2 %148  ;;  %v3637_v59 = vld [vmem:[#allocation30_spill] sm:$0xff] }
 0x190   :  { %1085 = vmatpush.xpose.msrb.mxu0 %v3107_v0  ;;  %1273 = vmatpush.xpose.msrb.mxu3 %v3107_v0  ;;  %v390_v15 = vsel %vm198_vm7, %v3637_v59, 0.0  ;;  %vm197_vm8 = vcmp.eq.s32.totalorder %v2861_v26, %v149_v51 }
 0x191   :  { %1173 = vmatpush.xpose.msrb.mxu1 %v1172_v14  ;;  %v3168_v14 = vsub.f32 %v393_v19, %v3148_v20  ;;  %v3635_v19 = vld [vmem:[#allocation28_spill] sm:$0xff] }
 0x192   :  { %1237 = vmatpush.xpose.msrb.mxu2 %v3123_v53 }
 0x193   :  { %v3551_v18 = vand.u32 4294901760, %v3168_v14 }
 0x194   :  { %1281 = vmatpush.xpose.msra.mxu0 %v1092_v30  ;;  %1423 = vmatpush.xpose.msra.mxu3 %v1422_v29  ;;  %v3634_v30 = vmov 0.0   ;;  %v391_v29 = vsel %vm199_vm6, %v3635_v19, 0.0 }
 0x195   :  { %1086 = vmatmul.f32.vlgmr.msrb.gmra.mxu0 %v3634_v30  ;;  %1179 = vmatpush.xpose.msrb.mxu1 %v1178_v40  ;;  %v1434_v40 = vand.u32 4294901760, %v1433_v25  ;;  %v3190_v0 = vand.u32 4294901760, %v391_v29  ;;  %v3199_v25 = vand.u32 4294901760, %v390_v15  ;;  %v1445_v59 = vsub.f32 %v3168_v14, %v3551_v18 }
 0x196   :  { %1383 = vmatpush.xpose.msra.mxu2 %v3075_v13  ;;  %1274 = vmatmul.f32.vlgmr.msrb.gmra.mxu3 %v3634_v30 }
 0x197   :  { %1238 = vmatmul.f32.vlgmr.msrb.gmra.mxu2 %v3634_v30  ;;  %v3208_v51 = vsub.f32 %v391_v29, %v3190_v0  ;;  %v1446_v29 = vand.u32 4294901760, %v1445_v59  ;;  %v140_v59 = vpop.permute.xlu2 %139 }
 0x198   :  { %1285 = vmatpush.xpose.msra.mxu0 %v3636_v52  ;;  %1429 = vmatpush.xpose.msra.mxu3 %v1428_v7  ;;  %v1439_v52 = vsub.f32 %v3152_v21, %v3638_v35  ;;  %v3641_v7 = vld [vmem:[#allocation31_spill] sm:$0xff]  ;;  %v143_v35 = vpop.permute.xlu0 %142  ;;  %vm194_vm11 = vcmp.eq.s32.totalorder %v2861_v26, %v140_v59 }
 0x199   :  { %1185 = vmatpush.xpose.msrb.mxu1 %v1184_v2  ;;  %v3640_v2 = vmov 1.0   ;;  %v389_v19 = vsel %vm197_vm8, %v3641_v7, 0.0  ;;  %vm195_vm10 = vcmp.eq.s32.totalorder %v2861_v26, %v143_v35 }
 0x19a   :  { %1385 = vmatpush.xpose.msra.mxu2 %v3097_v33  ;;  %v1440_v44 = vand.u32 4294901760, %v1439_v52  ;;  %v3218_v18 = vand.u32 4294901760, %v389_v19 }
 0x19c   :  { %1289 = vmatpush.xpose.msra.mxu0 %v3639_v49  ;;  %1435 = vmatpush.xpose.msra.mxu3 %v1434_v40  ;;  %v3642_v40 = vand.u32 4294901760, %v2933_v16  ;;  %v3216_v49 = vsub.f32 %v390_v15, %v3199_v25  ;;  %v1456_v16 = vand.u32 4294901760, %v3208_v51  ;;  %v3231_v15 = vsub.f32 %v389_v19, %v3218_v18  ;;  %v137_v19 = vpop.permute.xlu1 %136 }
 0x19d   :  { %1347 = vmatpush.xpose.msra.mxu1 %v2879_v5  ;;  %v1450_v5 = vand.u32 4294901760, %v3187_v31  ;;  %vm193_vm12 = vcmp.eq.s32.totalorder %v2861_v26, %v137_v19 }
 0x19e   :  { %1387 = vmatpush.xpose.msra.mxu2 %v3112_v6  ;;  %1186 = vmatmul.f32.vlgmr.msrb.gmra.mxu1 %v3640_v2  ;;  %v1462_v7 = vand.u32 4294901760, %v3216_v49 }
 0x19f   :  { %v1451_v52 = vsub.f32 %v3187_v31, %v1450_v5 }
 0x1a0   :  { %1293 = vmatpush.xpose.msra.mxu0 %v3642_v40  ;;  %1441 = vmatpush.xpose.msra.mxu3 %v1440_v44  ;;  %v387_v44 = vsel %vm195_vm10, %v2614_v8, 0.0  ;;  %v1468_v8 = vand.u32 4294901760, %v3231_v15  ;;  %v134_v59 = vpop.permute.xlu0 %133 }
 0x1a1   :  { %1349 = vmatpush.xpose.msra.mxu1 %v2891_v45  ;;  %v388_v45 = vsel %vm196_vm9, %v2593_v9, 0.0  ;;  %v1452_v35 = vand.u32 4294901760, %v1451_v52  ;;  %v1457_v9 = vsub.f32 %v3208_v51, %v1456_v16  ;;  %v3245_v38 = vand.u32 4294901760, %v387_v44 }
 0x1a2   :  { %1389 = vmatpush.xpose.msra.mxu2 %v3137_v1  ;;  %v3236_v40 = vand.u32 4294901760, %v388_v45  ;;  %vm192_vm13 = vcmp.eq.s32.totalorder %v2861_v26, %v134_v59 }
 0x1a3   :  { %v1458_v52 = vand.u32 4294901760, %v1457_v9 }
 0x1a4   :  { %1297 = vmatpush.xpose.msra.mxu0 %v3643_v34  ;;  %1447 = vmatpush.xpose.msra.mxu3 %v1446_v29  ;;  %v3250_v29 = vsub.f32 %v388_v45, %v3236_v40  ;;  %v3645_v34 = vand.u32 4294901760, %v2981_v63  ;;  %v1469_v45 = vsub.f32 %v3231_v15, %v1468_v8 }
 0x1a5   :  { %1351 = vmatpush.xpose.msra.mxu1 %v2905_v11  ;;  %v3644_v11 = vand.u32 4294901760, %v2970_v4  ;;  %v1463_v4 = vsub.f32 %v3216_v49, %v1462_v7 }
 0x1a6   :  { %1391 = vmatpush.xpose.msra.mxu2 %v3148_v20  ;;  %v1474_v63 = vand.u32 4294901760, %v3250_v29  ;;  %v1470_v19 = vand.u32 4294901760, %v1469_v45 }
 0x1a8   :  { %1301 = vmatpush.xpose.msra.mxu0 %v3644_v11  ;;  %1453 = vmatpush.xpose.msra.mxu3 %v1452_v35  ;;  %v3261_v35 = vsub.f32 %v387_v44, %v3245_v38  ;;  %v3646_v11 = vand.u32 4294901760, %v2995_v57  ;;  %v131_v44 = vpop.permute.xlu2 %130 }
 0x1a9   :  { %1353 = vmatpush.xpose.msra.mxu1 %v2912_v46  ;;  %v386_v46 = vsel %vm194_vm11, %v2632_v58, 0.0  ;;  %v1464_v58 = vand.u32 4294901760, %v1463_v4  ;;  %vm191_vm14 = vcmp.eq.s32.totalorder %v2861_v26, %v131_v44 }
 0x1aa   :  { %1393 = vmatpush.xpose.msra.mxu2 %v3175_v27  ;;  %v3267_v9 = vand.u32 4294901760, %v386_v46 }
 0x1ac   :  { %1305 = vmatpush.xpose.msra.mxu0 %v3645_v34  ;;  %1459 = vmatpush.xpose.msra.mxu3 %v1458_v52  ;;  %v1480_v52 = vand.u32 4294901760, %v3261_v35  ;;  %v3278_v4 = vsub.f32 %v386_v46, %v3267_v9  ;;  %v384_v34 = vsel %vm192_vm13, %v2663_v22, 0.0  ;;  %v128_v46 = vpop.permute.xlu1 %127 }
 0x1ad   :  { %1355 = vmatpush.xpose.msra.mxu1 %v2935_v37  ;;  %v385_v37 = vsel %vm193_vm12, %v2652_v47, 0.0  ;;  %v1475_v47 = vsub.f32 %v3250_v29, %v1474_v63  ;;  %v3290_v57 = vand.u32 4294901760, %v384_v34  ;;  %vm190_vm15 = vcmp.eq.s32.totalorder %v2861_v26, %v128_v46 }
 0x1ae   :  { %1395 = vmatpush.xpose.msra.mxu2 %v3190_v0  ;;  %v3281_v59 = vand.u32 4294901760, %v385_v37  ;;  %vm1787_vm12 = vcmask 1040384  }
 0x1af   :  { %v1476_v45 = vand.u32 4294901760, %v1475_v47  ;;  %v382_v47 = vsel %vm190_vm15, %v2698_v61, 0.0 }
 0x1b0   :  { %1309 = vmatpush.xpose.msra.mxu0 %v3646_v11  ;;  %1465 = vmatpush.xpose.msra.mxu3 %v1464_v58  ;;  %v3294_v22 = vsub.f32 %v385_v37, %v3281_v59  ;;  %v1481_v58 = vsub.f32 %v3261_v35, %v1480_v52  ;;  %v3648_v11 = vand.u32 4294901760, %v3019_v55  ;;  %v3306_v37 = vsub.f32 %v384_v34, %v3290_v57 }
 0x1b1   :  { %1357 = vmatpush.xpose.msra.mxu1 %v2952_v60  ;;  %v3647_v60 = vand.u32 4294901760, %v3005_v17  ;;  %v1486_v17 = vand.u32 4294901760, %v3278_v4 }
 0x1b2   :  { %1397 = vmatpush.xpose.msra.mxu2 %v3199_v25  ;;  %v1492_v55 = vand.u32 4294901760, %v3294_v22  ;;  %v1498_v26 = vand.u32 4294901760, %v3306_v37 }
 0x1b4   :  { %1313 = vmatpush.xpose.msra.mxu0 %v3647_v60  ;;  %1471 = vmatpush.xpose.msra.mxu3 %v1470_v19  ;;  %v1482_v19 = vand.u32 4294901760, %v1481_v58  ;;  %v3324_v60 = vand.u32 4294901760, %v382_v47  ;;  %v1493_v61 = vsub.f32 %v3294_v22, %v1492_v55  ;;  %v1499_v58 = vsub.f32 %v3306_v37, %v1498_v26 }
 0x1b5   :  { %1359 = vmatpush.xpose.msra.mxu1 %v2967_v42  ;;  %v383_v42 = vsel %vm191_vm14, %v2681_v54, 0.0  ;;  %v1487_v54 = vsub.f32 %v3278_v4, %v1486_v17 }
 0x1b6   :  { %1399 = vmatpush.xpose.msra.mxu2 %v3218_v18  ;;  %v3309_v44 = vand.u32 4294901760, %v383_v42 }
 0x1b7   :  { %v1488_v46 = vand.u32 4294901760, %v1487_v54  ;;  %v3652_v54 = vand.u32 4294901760, %v3089_v39 }
 0x1b8   :  { %1317 = vmatpush.xpose.msra.mxu0 %v3648_v11  ;;  %1477 = vmatpush.xpose.msra.mxu3 %v1476_v45  ;;  %v3322_v34 = vsub.f32 %v383_v42, %v3309_v44  ;;  %v1494_v45 = vand.u32 4294901760, %v1493_v61  ;;  %v3651_v11 = vand.u32 4294901760, %v3062_v36 }
 0x1b9   :  { %1361 = vmatpush.xpose.msra.mxu1 %v2984_v3  ;;  %v3649_v3 = vand.u32 4294901760, %v3040_v12  ;;  %v3650_v12 = vand.u32 4294901760, %v3047_v50 }
 0x1ba   :  { %1401 = vmatpush.xpose.msra.mxu2 %v3236_v40  ;;  %v1504_v42 = vand.u32 4294901760, %v3322_v34 }
 0x1bc   :  { %1321 = vmatpush.xpose.msra.mxu0 %v3649_v3  ;;  %1483 = vmatpush.xpose.msra.mxu3 %v1482_v19  ;;  %v1505_v50 = vsub.f32 %v3322_v34, %v1504_v42  ;;  %v3654_v3 = vand.u32 4294901760, %v3123_v53 }
 0x1bd   :  { %1363 = vmatpush.xpose.msra.mxu1 %v2990_v41  ;;  %v3334_v41 = vsub.f32 %v382_v47, %v3324_v60  ;;  %v3653_v47 = vand.u32 4294901760, %v3105_v56  ;;  %v3658_v56 = vld [vmem:[#allocation29_spill] sm:$0xff] }
 0x1be   :  { %1403 = vmatpush.xpose.msra.mxu2 %v3245_v38  ;;  %v1506_v36 = vand.u32 4294901760, %v1505_v50 }
 0x1bf   :  { %v1510_v19 = vand.u32 4294901760, %v3334_v41 }
 0x1c0   :  { %1325 = vmatpush.xpose.msra.mxu0 %v3650_v12  ;;  %1489 = vmatpush.xpose.msra.mxu3 %v1488_v46 }
 0x1c1   :  { %1365 = vmatpush.xpose.msra.mxu1 %v3007_v62  ;;  %v1500_v62 = vand.u32 4294901760, %v1499_v58 }
 0x1c2   :  { %1405 = vmatpush.xpose.msra.mxu2 %v3267_v9 }
 0x1c4   :  { %1329 = vmatpush.xpose.msra.mxu0 %v3651_v11  ;;  %1495 = vmatpush.xpose.msra.mxu3 %v1494_v45 }
 0x1c5   :  { %1367 = vmatpush.xpose.msra.mxu1 %v3024_v10  ;;  %v1511_v10 = vsub.f32 %v3334_v41, %v1510_v19 }
 0x1c6   :  { %1407 = vmatpush.xpose.msra.mxu2 %v3281_v59 }
 0x1c7   :  { %v1512_v39 = vand.u32 4294901760, %v1511_v10 }
 0x1c8   :  { %1333 = vmatpush.xpose.msra.mxu0 %v3652_v54  ;;  %1501 = vmatpush.xpose.msra.mxu3 %v1500_v62 }
 0x1c9   :  { %1369 = vmatpush.xpose.msra.mxu1 %v3032_v43  ;;  %v3655_v43 = vand.u32 4294901760, %v3094_v28 }
 0x1ca   :  { %1409 = vmatpush.xpose.msra.mxu2 %v3290_v57 }
 0x1cc   :  { %1337 = vmatpush.xpose.msra.mxu0 %v3653_v47  ;;  %1507 = vmatpush.xpose.msra.mxu3 %v1506_v36 }
 0x1cd   :  { %1371 = vmatpush.xpose.msra.mxu1 %v3049_v48  ;;  %v3656_v48 = vand.u32 4294901760, %v3116_v32 }
 0x1ce   :  { %1411 = vmatpush.xpose.msra.mxu2 %v3309_v44 }
 0x1d0   :  { %1341 = vmatpush.xpose.msra.mxu0 %v3654_v3  ;;  %1513 = vmatpush.xpose.msra.mxu3 %v1512_v39 }
 0x1d1   :  { %1373 = vmatpush.xpose.msra.mxu1 %v3067_v24  ;;  %v3657_v24 = vld [vmem:[#allocation27_spill] sm:$0xff] }
 0x1d2   :  { %1413 = vmatpush.xpose.msra.mxu2 %v3324_v60 }
 0x1d3   :  { %1342 = vmatmul.f32.vlgmr.msra.gmra.mxu0 %v3640_v2  ;;  %1514 = vmatmul.f32.vlgmr.msra.gmra.mxu3 %v3640_v2 }
 0x1d4   :  { %1520 = vmatpush.xpose.msrb.mxu0 %v3094_v28  ;;  %1675 = vmatpush.xpose.msrb.mxu3 %v3075_v13 }
 0x1d5   :  { %1375 = vmatpush.xpose.msra.mxu1 %v3086_v23  ;;  %1414 = vmatmul.f32.vlgmr.msra.gmra.mxu2 %v3634_v30  ;;  %v3659_v23 = vand.u32 4294901760, %v3658_v56 }
 0x1d6   :  { %1609 = vmatpush.xpose.msrb.mxu2 %v3655_v43 }
 0x1d8   :  { %1523 = vmatpush.xpose.msrb.mxu0 %v3116_v32  ;;  %1677 = vmatpush.xpose.msrb.mxu3 %v3097_v33  ;;  %v3660_v32 = vand.u32 4294901760, %v3152_v21 }
 0x1d9   :  { %1377 = vmatpush.xpose.msra.mxu1 %v3657_v24 }
 0x1da   :  { %1613 = vmatpush.xpose.msrb.mxu2 %v3656_v48 }
 0x1dc   :  { %1526 = vmatpush.xpose.msrb.mxu0 %v3658_v56  ;;  %1679 = vmatpush.xpose.msrb.mxu3 %v3112_v6 }
 0x1dd   :  { %1571 = vmatpush.xpose.msrb.mxu1 %v3075_v13  ;;  %v3661_v13 = vand.u32 4294901760, %v3168_v14 }
 0x1de   :  { %1378 = vmatmul.f32.vlgmr.msra.gmra.mxu1 %v3640_v2  ;;  %1617 = vmatpush.xpose.msrb.mxu2 %v3659_v23 }
 0x1e0   :  { %1529 = vmatpush.xpose.msrb.mxu0 %v3152_v21  ;;  %1681 = vmatpush.xpose.msrb.mxu3 %v3137_v1  ;;  %v531_v21 = vpop.f32.mrf.mxu1 }
 0x1e1   :  { %1573 = vmatpush.xpose.msrb.mxu1 %v3097_v33  ;;  %v583_v33 = vpop.f32.mrf.mxu2 }
 0x1e2   :  { %1621 = vmatpush.xpose.msrb.mxu2 %v3660_v32 }
 0x1e4   :  { %1532 = vmatpush.xpose.msrb.mxu0 %v3168_v14  ;;  %1683 = vmatpush.xpose.msrb.mxu3 %v3148_v20 }
 0x1e5   :  { %1575 = vmatpush.xpose.msrb.mxu1 %v3112_v6 }
 0x1e6   :  { %1625 = vmatpush.xpose.msrb.mxu2 %v3661_v13 }
 0x1e8   :  { %1535 = vmatpush.xpose.msrb.mxu0 %v3187_v31  ;;  %1685 = vmatpush.xpose.msrb.mxu3 %v3175_v27  ;;  %v723_v28 = vpop.f32.mrf.mxu1 }
 0x1e9   :  { %1577 = vmatpush.xpose.msrb.mxu1 %v3137_v1  ;;  %v431_v1 = vpop.f32.mrf.mxu0  ;;  %v759_v6 = vpop.f32.mrf.mxu2 }
 0x1ea   :  { %1629 = vmatpush.xpose.msrb.mxu2 %v1450_v5  ;;  %v532_v53 = vadd.f32 %v531_v21, %v431_v1 }
 0x1ec   :  { %1538 = vmatpush.xpose.msrb.mxu0 %v3208_v51  ;;  %1687 = vmatpush.xpose.msrb.mxu3 %v3190_v0 }
 0x1ed   :  { %1579 = vmatpush.xpose.msrb.mxu1 %v3148_v20 }
 0x1ee   :  { %1633 = vmatpush.xpose.msrb.mxu2 %v1456_v16 }
 0x1f0   :  { %1541 = vmatpush.xpose.msrb.mxu0 %v3216_v49  ;;  %1689 = vmatpush.xpose.msrb.mxu3 %v3199_v25  ;;  %v947_v31 = vpop.f32.mrf.mxu1 }
 0x1f1   :  { %1581 = vmatpush.xpose.msrb.mxu1 %v3175_v27  ;;  %v687_v20 = vpop.f32.mrf.mxu0  ;;  %v584_v27 = vadd.f32 %v583_v33, %v532_v53  ;;  %v1015_v51 = vpop.f32.mrf.mxu2 }
 0x1f2   :  { %1637 = vmatpush.xpose.msrb.mxu2 %v1462_v7 }
 0x1f4   :  { %1544 = vmatpush.xpose.msrb.mxu0 %v3231_v15  ;;  %1691 = vmatpush.xpose.msrb.mxu3 %v3218_v18 }
 0x1f5   :  { %1583 = vmatpush.xpose.msrb.mxu1 %v3190_v0  ;;  %v619_v0 = vpop.f32.mrf.mxu3 }
 0x1f6   :  { %1641 = vmatpush.xpose.msrb.mxu2 %v1468_v8 }
 0x1f8   :  { %1547 = vmatpush.xpose.msrb.mxu0 %v3250_v29  ;;  %1693 = vmatpush.xpose.msrb.mxu3 %v3236_v40 }
 0x1f9   :  { %1585 = vmatpush.xpose.msrb.mxu1 %v3199_v25  ;;  %v620_v25 = vadd.f32 %v619_v0, %v584_v27 }
 0x1fa   :  { %1645 = vmatpush.xpose.msrb.mxu2 %v1474_v63 }
 0x1fb   :  { %v688_v5 = vadd.f32 %v687_v20, %v620_v25 }
 0x1fc   :  { %1550 = vmatpush.xpose.msrb.mxu0 %v3261_v35  ;;  %1695 = vmatpush.xpose.msrb.mxu3 %v3245_v38 }
 0x1fd   :  { %1587 = vmatpush.xpose.msrb.mxu1 %v3218_v18  ;;  %v859_v14 = vpop.f32.mrf.mxu3  ;;  %v911_v18 = vpop.f32.mrf.mxu0  ;;  %v3453_v15 = vadd.f32 %v723_v28, %v688_v5 }
 0x1fe   :  { %1649 = vmatpush.xpose.msrb.mxu2 %v1480_v52 }
 0x1ff   :  { %1882 = vrcp.f32 %v3453_v15  ;;  %v1731_v46 = vand.u32 2147483648, %v3453_v15  ;;  %vm1725_vm1 = vweird.f32 %v3453_v15  ;;  %v1729_v61 = vand.u32 2147483647, %v3453_v15 }
 0x200   :  { %1553 = vmatpush.xpose.msrb.mxu0 %v3278_v4  ;;  %1697 = vmatpush.xpose.msrb.mxu3 %v3267_v9 }
 0x201   :  { %1589 = vmatpush.xpose.msrb.mxu1 %v3236_v40  ;;  %v860_v40 = vadd.f32 %v859_v14, %v759_v6  ;;  %vm1730_vm3 = vcmp.eq.f32.partialorder %v1729_v61, 8.507059e+37 }
 0x202   :  { %1653 = vmatpush.xpose.msrb.mxu2 %v1486_v17 }
 0x203   :  { %v912_v29 = vadd.f32 %v911_v18, %v860_v40 }
 0x204   :  { %1556 = vmatpush.xpose.msrb.mxu0 %v3294_v22  ;;  %1699 = vmatpush.xpose.msrb.mxu3 %v3281_v59 }
 0x205   :  { %1591 = vmatpush.xpose.msrb.mxu1 %v3245_v38  ;;  %v1883_v63 = vpop.eup %1882  ;;  %v948_v52 = vadd.f32 %v947_v31, %v912_v29 }
 0x206   :  { %1657 = vmatpush.xpose.msrb.mxu2 %v1492_v55  ;;  %vm1726_vm0 = vweird.f32 %v1883_v63 }
 0x207   :  { %v1016_v22 = vadd.f32 %v1015_v51, %v948_v52  ;;  %vm1727_vm2 = vmor %vm1725_vm1, %vm1726_vm0 }
 0x208   :  { %1559 = vmatpush.xpose.msrb.mxu0 %v3306_v37  ;;  %1701 = vmatpush.xpose.msrb.mxu3 %v3290_v57 }
 0x209   :  { %1593 = vmatpush.xpose.msrb.mxu1 %v3267_v9 }
 0x20a   :  { %1661 = vmatpush.xpose.msrb.mxu2 %v1498_v26 }
 0x20c   :  { %1562 = vmatpush.xpose.msrb.mxu0 %v3322_v34  ;;  %1703 = vmatpush.xpose.msrb.mxu3 %v3309_v44 }
 0x20d   :  { %1595 = vmatpush.xpose.msrb.mxu1 %v3281_v59 }
 0x20e   :  { %1665 = vmatpush.xpose.msrb.mxu2 %v1504_v42  ;;  %v1732_v42 = vor.u32 1.1754944e-38, %v1731_v46 }
 0x210   :  { %1565 = vmatpush.xpose.msrb.mxu0 %v3334_v41  ;;  %1705 = vmatpush.xpose.msrb.mxu3 %v3324_v60 }
 0x211   :  { %1597 = vmatpush.xpose.msrb.mxu1 %v3290_v57  ;;  %v1721_v57 = vmul.f32 %v1883_v63, %v3453_v15 }
 0x212   :  { %1669 = vmatpush.xpose.msrb.mxu2 %v1510_v19  ;;  %v1087_v16 = vpop.f32.mrf.mxu0 }
 0x213   :  { %1566 = vmatmul.f32.vlgmr.msrb.gmra.mxu0 %v3634_v30  ;;  %1706 = vmatmul.f32.vlgmr.msrb.gmra.mxu3 %v3640_v2  ;;  %v1722_v37 = vsub.f32 1.0, %v1721_v57 }
 0x215   :  { %1599 = vmatpush.xpose.msrb.mxu1 %v3309_v44  ;;  %1670 = vmatmul.f32.vlgmr.msrb.gmra.mxu2 %v3640_v2  ;;  %v1051_v2 = vpop.f32.mrf.mxu3  ;;  %v1723_v26 = vmul.f32 %v1883_v63, %v1722_v37 }
 0x216   :  { %v1052_v44 = vadd.f32 %v1051_v2, %v1016_v22 }
 0x217   :  { %v1724_v34 = vadd.f32 %v1883_v63, %v1723_v26 }
 0x218   :  { %1884 = vrcp.f32 %v1052_v44  ;;  %v1746_v1 = vand.u32 2147483648, %v1052_v44  ;;  %vm1740_vm6 = vweird.f32 %v1052_v44  ;;  %v1744_v33 = vand.u32 2147483647, %v1052_v44 }
 0x219   :  { %1601 = vmatpush.xpose.msrb.mxu1 %v3324_v60  ;;  %v1728_v45 = vsel %vm1727_vm2, %v1883_v63, %v1724_v34 }
 0x21a   :  { %v1239_v7 = vpop.f32.mrf.mxu2  ;;  %v1733_v19 = vsel %vm1730_vm3, %v1732_v42, %v1728_v45  ;;  %v1747_v20 = vor.u32 1.1754944e-38, %v1746_v1  ;;  %vm1745_vm8 = vcmp.eq.f32.partialorder %v1744_v33, 8.507059e+37 }
 0x21b   :  { %v1187_v49 = vpop.f32.mrf.mxu1 }
 0x21c   :  { %1602 = vmatmul.f32.vlgmr.msrb.gmra.mxu1 %v3634_v30  ;;  %v1188_v30 = vadd.f32 %v1187_v49, %v1087_v16 }
 0x21d   :  { %v1275_v8 = vpop.f32.mrf.mxu3 }
 0x21e   :  { %v1240_v38 = vadd.f32 %v1239_v7, %v1188_v30  ;;  %v1885_v41 = vpop.eup %1884 }
 0x21f   :  { %v1736_v50 = vmul.f32 %v1885_v41, %v1052_v44  ;;  %vm1741_vm4 = vweird.f32 %v1885_v41 }
 0x220   :  { %v1276_v35 = vadd.f32 %v1275_v8, %v1240_v38  ;;  %vm1742_vm7 = vmor %vm1740_vm6, %vm1741_vm4 }
 0x221   :  { %v1737_v39 = vsub.f32 1.0, %v1736_v50 }
 0x223   :  { %v1738_v56 = vmul.f32 %v1885_v41, %v1737_v39 }
 0x225   :  { %v1739_v21 = vadd.f32 %v1885_v41, %v1738_v56 }
 0x227   :  { %v1743_v0 = vsel %vm1742_vm7, %v1885_v41, %v1739_v21  ;;  %v3662_v41 = vlaneseq }
 0x228   :  { %v1748_v14 = vsel %vm1745_vm8, %v1747_v20, %v1743_v0 }
 0x229   :  { %vm1792_vm13 = vcmp.lt.s32.totalorder %v3662_v41, 256 }
 0x250   :  { %v1343_v9 = vpop.f32.mrf.mxu0 }
 0x251   :  { %v1344_v4 = vadd.f32 %v1343_v9, %v1276_v35 }
 0x256   :  { %v1515_v12 = vpop.f32.mrf.mxu3 }
 0x258   :  { %v1415_v60 = vpop.f32.mrf.mxu2 }
 0x259   :  { %v1516_v11 = vadd.f32 %v1515_v12, %v1415_v60 }
 0x25b   :  { %v1379_v59 = vpop.f32.mrf.mxu1 }
 0x25c   :  { %v3457_v17 = vadd.f32 %v1379_v59, %v1344_v4 }
 0x25e   :  { %v1714_v55 = vmul.f32 1.442695, %v3457_v17 }
 0x260   :  { %1886 = vpow2.f32 %v1714_v55 }
 0x266   :  { %v1887_v58 = vpop.eup %1886 }
 0x267   :  { %v1734_v54 = vmul.f32 %v1887_v58, %v1733_v19  ;;  %v1718_v6 = vsub.f32 %v3453_v15, %v1887_v58 }
 0x269   :  { %v1764_v43 = vmax.f32 %v1734_v54, 0.0  ;;  %v1750_v18 = vmul.f32 %v1733_v19, %v1718_v6 }
 0x26b   :  { %v1766_v32 = vsub.f32 %v1734_v54, %v1764_v43  ;;  %vm1752_vm11 = vcmp.gt.f32.partialorder %v1750_v18, 0.0 }
 0x26d   :  { %vm1768_vm5 = vcmp.gt.f32.partialorder %v1766_v32, 0.0 }
 0x26e   :  { %v1770_v28 = vsel %vm1768_vm5, %v1766_v32, 1.0 }
 0x290   :  { %v1567_v62 = vpop.f32.mrf.mxu0 }
 0x291   :  { %v1568_v36 = vadd.f32 %v1567_v62, %v1516_v11 }
 0x296   :  { %v1707_v48 = vpop.f32.mrf.mxu3 }
 0x298   :  { %v1671_v47 = vpop.f32.mrf.mxu2 }
 0x299   :  { %v1603_v10 = vpop.f32.mrf.mxu1 }
 0x29a   :  { %v1604_v3 = vadd.f32 %v1603_v10, %v1568_v36 }
 0x29c   :  { %v1672_v24 = vadd.f32 %v1671_v47, %v1604_v3 }
 0x29e   :  { %v1708_v23 = vadd.f32 %v1707_v48, %v1672_v24 }
 0x2a0   :  { %v1716_v13 = vmul.f32 1.442695, %v1708_v23 }
 0x2a2   :  { %1888 = vpow2.f32 %v1716_v13 }
 0x2a3   :  { %1890 = vlog2.f32 %v3453_v15 }
 0x2a4   :  { %1892 = vlog2.f32 %v1770_v28 }
 0x2a5   :  { %1894 = vlog2.f32 %v1052_v44 }
 0x2a8   :  { %v1889_v53 = vpop.eup %1888 }
 0x2a9   :  { %v1719_v27 = vsub.f32 %v1052_v44, %v1889_v53  ;;  %v1749_v31 = vmul.f32 %v1889_v53, %v1748_v14  ;;  %v1891_v2 = vpop.eup %1890 }
 0x2aa   :  { %v1893_v49 = vpop.eup %1892  ;;  %v1711_v7 = vmul.f32 0.6931472, %v1891_v2 }
 0x2ab   :  { %v1751_v25 = vmul.f32 %v1748_v14, %v1719_v27  ;;  %v1765_v51 = vmax.f32 %v1749_v31, 0.0  ;;  %v1895_v30 = vpop.eup %1894  ;;  %v1773_v15 = vmul.f32 0.6931472, %v1893_v49 }
 0x2ac   :  { %v1762_v38 = vsub.f32 %v3457_v17, %v1711_v7  ;;  %v1713_v35 = vmul.f32 0.6931472, %v1895_v30 }
 0x2ad   :  { %1896 = vlog2.f32 %v1751_v25  ;;  %v1767_v5 = vsub.f32 %v1749_v31, %v1765_v51  ;;  %vm1753_vm10 = vcmp.gt.f32.partialorder %v1751_v25, 0.0 }
 0x2ae   :  { %1898 = vlog2.f32 %v1750_v18  ;;  %v1776_v29 = vsub.f32 %v1773_v15, %v1762_v38  ;;  %v1763_v52 = vsub.f32 %v1708_v23, %v1713_v35 }
 0x2af   :  { %vm1769_vm9 = vcmp.gt.f32.partialorder %v1767_v5, 0.0 }
 0x2b0   :  { %v1771_v16 = vsel %vm1769_vm9, %v1767_v5, 1.0  ;;  %v1778_v57 = vmul.f32 %v1776_v29, %v1766_v32 }
 0x2b1   :  { %1900 = vlog2.f32 %v1771_v16 }
 0x2b2   :  { %v1780_v26 = vsel %vm1768_vm5, %v1778_v57, 0.0 }
 0x2b3   :  { %v1897_v40 = vpop.eup %1896 }
 0x2b4   :  { %v1899_v8 = vpop.eup %1898  ;;  %v1757_v9 = vmul.f32 0.6931472, %v1897_v40 }
 0x2b5   :  { %v1755_v59 = vmul.f32 0.6931472, %v1899_v8 }
 0x2b6   :  { %v1759_v37 = vsub.f32 0.0, %v1757_v9 }
 0x2b7   :  { %v1901_v63 = vpop.eup %1900  ;;  %v1758_v55 = vsub.f32 0.0, %v1755_v59 }
 0x2b8   :  { %v1775_v4 = vmul.f32 0.6931472, %v1901_v63  ;;  %v1761_v60 = vsel %vm1753_vm10, %v1759_v37, 0.0 }
 0x2b9   :  { %v1760_v46 = vsel %vm1752_vm11, %v1758_v55, 0.0 }
 0x2ba   :  { %v1777_v22 = vsub.f32 %v1775_v4, %v1763_v52  ;;  %v1782_v61 = vadd.f32 %v1780_v26, %v1760_v46 }
 0x2bc   :  { %v1779_v44 = vmul.f32 %v1777_v22, %v1767_v5 }
 0x2be   :  { %v1781_v34 = vsel %vm1769_vm9, %v1779_v44, 0.0 }
 0x2bf   :  { %v1783_v17 = vadd.f32 %v1781_v34, %v1761_v60 }
 0x2c1   :  { %v1786_v12 = vrot.slane %v1783_v17, 7 }
 0x2c3   :  { %v1788_v45 = vsel %vm1787_vm12, %v1782_v61, %v1786_v12 }
 0x2c4   :  { %1794 = vst.msk [vmem:[#allocation2] sm:$0x3] %vm1792_vm13, %v1788_v45 }
 0x2c5   :  { %1805 = dma.vmem_to_hbm [thread:$0]  %s1801_s1, 32, %s1803_s25, [#allocation3]  }
 0x2c6   :  { %1926 = dma.done.wait [#allocation3], 32  }
 0x2c7   :  { %1927 = vsyncadd [#allocation3], 4294967264 }
 0x2c8   :  { %1810 = vsyncpa [#allocation3], 1 }

</bundles_post_ra>
